<compile_context>
chip_gen: v5e
topology: v5e:2x2
jax: 0.10.0
libtpu: 0.0.40
codegen_flags: <defaults>
</compile_context>

<pallas_src>
import functools

import jax
import jax.numpy as jnp
from jax import lax
from jax.experimental import pallas as pl
from jax.experimental.pallas import tpu as pltpu

BN_EPS = 1e-5  # nn.BatchNorm2d default


def _round_up(x, m):
    return (x + m - 1) // m * m


def _conv3x3_im2col(a, w_ref, hout, row_offset):
    """3x3 stride-1 'SAME' conv over rows [row_offset, row_offset + hout) of `a`.

    a:      (Ha, W, C) activation value; rows outside the image are already zero.
    w_ref:  (9*C, C_out) bf16 weight ref, K ordered as (ky, kx, cin).
    returns (hout*W, C_out) float32.
    """
    a = a.astype(jnp.bfloat16)
    Ha, W, C = a.shape
    zcol = jnp.zeros((Ha, 1, C), a.dtype)
    a_left = jnp.concatenate([zcol, a[:, : W - 1, :]], axis=1)   # value at column c-1
    a_right = jnp.concatenate([a[:, 1:, :], zcol], axis=1)       # value at column c+1
    shifted = (a_left, a, a_right)                               # index by dx + 1

    cols = []
    for dy in (-1, 0, 1):
        r = row_offset + dy
        for dx in (-1, 0, 1):
            # row slice on the leading (untiled) dim is free; lane dim stays dense.
            cols.append(shifted[dx + 1][r:r + hout].reshape(hout * W, C))
    patches = jnp.concatenate(cols, axis=1)                      # (hout*W, 9*C)
    return jnp.dot(patches, w_ref[...], preferred_element_type=jnp.float32)


def _basic_block_kernel(x_ref, xtop_ref, xbot_ref, w1_ref, w2_ref,
                        s1_ref, b1_ref, s2_ref, b2_ref, o_ref, *, H, TH, W, Cp):
    b = pl.program_id(1)
    r0 = b * TH                                   # first image row of this band

    # x band with a 2-row halo on each side; zero rows that fall outside the image.
    x_ext = jnp.concatenate([xtop_ref[0], x_ref[0], xbot_ref[0]], axis=0)  # (TH+4, W, Cp)
    rows = lax.broadcasted_iota(jnp.int32, (TH + 4, 1, 1), 0) + (r0 - 2)
    x_ext = jnp.where((rows >= 0) & (rows < H), x_ext, 0.0)

    # conv1 (3x3) -> bn1 -> relu, computed for rows [r0-1, r0+TH+1) (halo for conv2).
    h1 = _conv3x3_im2col(x_ext, w1_ref, TH + 2, 1)               # ((TH+2)*W, Cp) f32
    h1 = jnp.maximum(h1 * s1_ref[...] + b1_ref[...], 0.0)
    h1 = h1.reshape(TH + 2, W, Cp)
    rows1 = lax.broadcasted_iota(jnp.int32, (TH + 2, 1, 1), 0) + (r0 - 1)
    h1 = jnp.where((rows1 >= 0) & (rows1 < H), h1, 0.0)          # conv2 zero padding

    # conv2 (3x3) -> bn2.
    h2 = _conv3x3_im2col(h1, w2_ref, TH, 1)                      # (TH*W, Cp) f32
    h2 = h2 * s2_ref[...] + b2_ref[...]

    # residual add (downsample=None -> identity) + relu.
    identity = x_ref[0].reshape(TH * W, Cp).astype(jnp.float32)
    out = jnp.maximum(h2 + identity, 0.0)
    o_ref[0] = out.reshape(TH, W, Cp).astype(o_ref.dtype)


def basic_block_forward(x_nchw, params, *, tile_h=None):
    """x_nchw: (N, Cin, H, W) like PyTorch. Returns NCHW output."""
    x = jnp.transpose(x_nchw, (0, 2, 3, 1)).astype(jnp.float32)  # NCHW -> NHWC
    N, H, W, C = x.shape
    w1, w2 = params['w1'], params['w2']          # torch layout (Cout, Cin, 3, 3)
    planes = w1.shape[0]
    assert w1.shape[1] == C and w2.shape[0] == planes and w2.shape[1] == planes
    assert planes == C, "downsample=None requires inplanes == planes"

    Cp = _round_up(C, 128)                       # lane-dense channel padding

    if tile_h is None:
        tile_h = next((t for t in (32, 16, 8, 4, 2) if H % t == 0), H)
    TH = tile_h
    assert H % 2 == 0 and TH % 2 == 0 and H % TH == 0
    nb = H // TH

    def pad_w(w):  # (Cout, Cin, 3, 3) -> (9*Cp, Cp) bf16, K ordered (ky, kx, cin)
        w = jnp.transpose(w, (2, 3, 1, 0))       # -> (3, 3, Cin, Cout)
        w = jnp.pad(w, ((0, 0), (0, 0), (0, Cp - w.shape[2]), (0, Cp - w.shape[3])))
        return w.reshape(9 * Cp, Cp).astype(jnp.bfloat16)

    def bn_affine(gamma, beta, mean, var):
        s = gamma / jnp.sqrt(var + BN_EPS)
        t = beta - mean * s
        s = jnp.pad(s, (0, Cp - s.shape[0]))
        t = jnp.pad(t, (0, Cp - t.shape[0]))
        return s.reshape(1, Cp).astype(jnp.float32), t.reshape(1, Cp).astype(jnp.float32)

    xp = jnp.pad(x, ((0, 0), (0, 0), (0, 0), (0, Cp - C)))
    w1p, w2p = pad_w(w1), pad_w(w2)
    s1, b1 = bn_affine(*params['bn1'])
    s2, b2 = bn_affine(*params['bn2'])

    kernel = functools.partial(_basic_block_kernel, H=H, TH=TH, W=W, Cp=Cp)

    halo_top = lambda n, b: (n, jnp.maximum(b * (TH // 2) - 1, 0), 0, 0)
    halo_bot = lambda n, b: (n, jnp.minimum((b + 1) * (TH // 2), H // 2 - 1), 0, 0)

    flops = 2 * 2 * N * H * W * (9 * Cp) * Cp            # two im2col matmuls
    bytes_accessed = 2 * xp.size * 4 + (w1p.size + w2p.size) * 2

    out_p = pl.pallas_call(
        kernel,
        out_shape=jax.ShapeDtypeStruct((N, H, W, Cp), x.dtype),
        grid=(N, nb),
        in_specs=[
            pl.BlockSpec((1, TH, W, Cp), lambda n, b: (n, b, 0, 0)),   # x band
            pl.BlockSpec((1, 2, W, Cp), halo_top),                     # 2-row top halo
            pl.BlockSpec((1, 2, W, Cp), halo_bot),                     # 2-row bottom halo
            pl.BlockSpec((9 * Cp, Cp), lambda n, b: (0, 0)),           # w1 (resident)
            pl.BlockSpec((9 * Cp, Cp), lambda n, b: (0, 0)),           # w2 (resident)
            pl.BlockSpec((1, Cp), lambda n, b: (0, 0)),                # bn1 scale
            pl.BlockSpec((1, Cp), lambda n, b: (0, 0)),                # bn1 bias
            pl.BlockSpec((1, Cp), lambda n, b: (0, 0)),                # bn2 scale
            pl.BlockSpec((1, Cp), lambda n, b: (0, 0)),                # bn2 bias
        ],
        out_specs=pl.BlockSpec((1, TH, W, Cp), lambda n, b: (n, b, 0, 0)),
        compiler_params=pltpu.CompilerParams(
            dimension_semantics=("parallel", "parallel"),
            vmem_limit_bytes=32 * 1024 * 1024),
        cost_estimate=pl.CostEstimate(flops=flops, transcendentals=0,
                                      bytes_accessed=bytes_accessed),
    )(xp, xp, xp, w1p, w2p, s1, b1, s2, b2)

    out = out_p[:, :, :, :C]                     # drop channel padding
    return jnp.transpose(out, (0, 3, 1, 2))      # NHWC -> NCHW


def reference_forward(x_nchw, params):
    """Pure-JAX reference (eval-mode BN), same math/rounding as the kernel."""
    x = jnp.transpose(x_nchw, (0, 2, 3, 1)).astype(jnp.float32)

    def bn(h, stats):
        g, b, m, v = stats
        return (h - m) / jnp.sqrt(v + BN_EPS) * g + b

    def conv3x3(h, w):  # bf16-rounded operands, f32 accumulation (matches kernel)
        hb = h.astype(jnp.bfloat16).astype(jnp.float32)
        wb = jnp.transpose(w, (2, 3, 1, 0)).astype(jnp.bfloat16).astype(jnp.float32)
        return lax.conv_general_dilated(
            hb, wb, window_strides=(1, 1), padding='SAME',
            dimension_numbers=('NHWC', 'HWIO', 'NHWC'),
            precision=lax.Precision.HIGHEST)

    h = jax.nn.relu(bn(conv3x3(x, params['w1']), params['bn1']))
    h = bn(conv3x3(h, params['w2']), params['bn2'])
    out = jax.nn.relu(h + x)
    return jnp.transpose(out, (0, 3, 1, 2))


def make_bn_params(key, c):
    k1, k2, k3, k4 = jax.random.split(key, 4)
    gamma = 1.0 + 0.1 * jax.random.normal(k1, (c,), jnp.float32)
    beta = 0.1 * jax.random.normal(k2, (c,), jnp.float32)
    mean = 0.1 * jax.random.normal(k3, (c,), jnp.float32)
    var = jnp.abs(jax.random.normal(k4, (c,), jnp.float32)) + 0.5
    return (gamma, beta, mean, var)


if __name__ == "__main__":
    key = jax.random.PRNGKey(0)
    N, planes, H, W = 2, 4, 16, 16
    inplanes = planes   # stride=1, downsample=None -> identity add needs inplanes == planes

    ks = jax.random.split(key, 5)
    x = jax.random.normal(ks[0], (N, inplanes, H, W), jnp.float32)   # NCHW like PyTorch

    params = {
        'w1': 0.1 * jax.random.normal(ks[1], (planes, inplanes, 3, 3), jnp.float32),
        'w2': 0.1 * jax.random.normal(ks[2], (planes, planes, 3, 3), jnp.float32),
        'bn1': make_bn_params(ks[3], planes),
        'bn2': make_bn_params(ks[4], planes),
    }

    fwd = jax.jit(functools.partial(basic_block_forward, tile_h=8))  # 2 row-bands
    out = jax.block_until_ready(fwd(x, params))
    ref = reference_forward(x, params)

    assert out.shape == (N, planes, H, W), out.shape
    max_err = jnp.max(jnp.abs(out - ref))
    assert jnp.allclose(out, ref, atol=1e-3, rtol=1e-3), f"max abs err = {max_err}"

    print("KERNEL_OK")
</pallas_src>

<mosaic_0001>
module attributes {stable_mosaic.version = 11 : i64} {
  func.func @_basic_block_kernel(%arg0: i32, %arg1: i32, %arg2: memref<1x8x16x128xf32, #tpu.memory_space<vmem>>, %arg3: memref<1x2x16x128xf32, #tpu.memory_space<vmem>>, %arg4: memref<1x2x16x128xf32, #tpu.memory_space<vmem>>, %arg5: memref<1152x128xbf16, #tpu.memory_space<vmem>>, %arg6: memref<1152x128xbf16, #tpu.memory_space<vmem>>, %arg7: memref<1x128xf32, #tpu.memory_space<vmem>>, %arg8: memref<1x128xf32, #tpu.memory_space<vmem>>, %arg9: memref<1x128xf32, #tpu.memory_space<vmem>>, %arg10: memref<1x128xf32, #tpu.memory_space<vmem>>, %arg11: memref<1x8x16x128xf32, #tpu.memory_space<vmem>>) attributes {dimension_semantics = [#tpu.dimension_semantics<parallel>, #tpu.dimension_semantics<parallel>], iteration_bounds = array<i64: 2, 2>, scalar_prefetch = 0 : i64, scratch_operands = 0 : i64, tpu.core_type = #tpu.core_type<tc>, window_params = [{transform_indices = @transform_0, window_bounds = array<i64: 1, 8, 16, 128>}, {transform_indices = @transform_1, window_bounds = array<i64: 1, 2, 16, 128>}, {transform_indices = @transform_2, window_bounds = array<i64: 1, 2, 16, 128>}, {pipeline_mode = #tpu.pipeline_mode<synchronous>, transform_indices = @transform_3, window_bounds = array<i64: 1152, 128>}, {pipeline_mode = #tpu.pipeline_mode<synchronous>, transform_indices = @transform_4, window_bounds = array<i64: 1152, 128>}, {pipeline_mode = #tpu.pipeline_mode<synchronous>, transform_indices = @transform_5, window_bounds = array<i64: 1, 128>}, {pipeline_mode = #tpu.pipeline_mode<synchronous>, transform_indices = @transform_6, window_bounds = array<i64: 1, 128>}, {pipeline_mode = #tpu.pipeline_mode<synchronous>, transform_indices = @transform_7, window_bounds = array<i64: 1, 128>}, {pipeline_mode = #tpu.pipeline_mode<synchronous>, transform_indices = @transform_8, window_bounds = array<i64: 1, 128>}, {transform_indices = @transform_9, window_bounds = array<i64: 1, 8, 16, 128>}]} {
    %c8_i32 = arith.constant 8 : i32
    %0 = arith.muli %arg1, %c8_i32 : i32
    %c0 = arith.constant 0 : index
    %c0_0 = arith.constant 0 : index
    %c0_1 = arith.constant 0 : index
    %c0_2 = arith.constant 0 : index
    %1 = vector.load %arg3[%c0, %c0_0, %c0_1, %c0_2] : memref<1x2x16x128xf32, #tpu.memory_space<vmem>>, vector<1x2x16x128xf32>
    %2 = vector.shape_cast %1 : vector<1x2x16x128xf32> to vector<2x16x128xf32>
    %c0_3 = arith.constant 0 : index
    %c0_4 = arith.constant 0 : index
    %c0_5 = arith.constant 0 : index
    %c0_6 = arith.constant 0 : index
    %3 = vector.load %arg2[%c0_3, %c0_4, %c0_5, %c0_6] : memref<1x8x16x128xf32, #tpu.memory_space<vmem>>, vector<1x8x16x128xf32>
    %4 = vector.shape_cast %3 : vector<1x8x16x128xf32> to vector<8x16x128xf32>
    %c0_7 = arith.constant 0 : index
    %c0_8 = arith.constant 0 : index
    %c0_9 = arith.constant 0 : index
    %c0_10 = arith.constant 0 : index
    %5 = vector.load %arg4[%c0_7, %c0_8, %c0_9, %c0_10] : memref<1x2x16x128xf32, #tpu.memory_space<vmem>>, vector<1x2x16x128xf32>
    %6 = vector.shape_cast %5 : vector<1x2x16x128xf32> to vector<2x16x128xf32>
    %7 = tpu.concatenate %2, %4, %6 in 0 : vector<2x16x128xf32>, vector<8x16x128xf32>, vector<2x16x128xf32> -> vector<12x16x128xf32>
    %8 = tpu.iota {dimensions = array<i32: 0>} : vector<12x1x1xi32>
    %c2_i32 = arith.constant 2 : i32
    %9 = arith.subi %0, %c2_i32 : i32
    %10 = vector.broadcast %9 : i32 to vector<12x1x1xi32>
    %11 = arith.addi %8, %10 : vector<12x1x1xi32>
    %c0_i32 = arith.constant 0 : i32
    %12 = vector.broadcast %c0_i32 : i32 to vector<12x1x1xi32>
    %13 = arith.cmpi sge, %11, %12 : vector<12x1x1xi32>
    %c16_i32 = arith.constant 16 : i32
    %14 = vector.broadcast %c16_i32 : i32 to vector<12x1x1xi32>
    %15 = arith.cmpi slt, %11, %14 : vector<12x1x1xi32>
    %16 = arith.andi %13, %15 : vector<12x1x1xi1>
    %cst = arith.constant 0.000000e+00 : f32
    %17 = vector.shape_cast %16 : vector<12x1x1xi1> to vector<12x1x1xi1>
    %18 = vector.broadcast %17 : vector<12x1x1xi1> to vector<12x16x128xi1>
    %19 = vector.broadcast %cst : f32 to vector<12x16x128xf32>
    %20 = arith.select %18, %7, %19 : vector<12x16x128xi1>, vector<12x16x128xf32>
    %21 = arith.truncf %20 : vector<12x16x128xf32> to vector<12x16x128xbf16>
    %cst_11 = arith.constant 0.000000e+00 : bf16
    %22 = vector.broadcast %cst_11 : bf16 to vector<12x1x128xbf16>
    %23 = vector.extract_strided_slice %21 {offsets = [0, 0, 0], sizes = [12, 15, 128], strides = [1, 1, 1]} : vector<12x16x128xbf16> to vector<12x15x128xbf16>
    %24 = tpu.concatenate %22, %23 in 1 : vector<12x1x128xbf16>, vector<12x15x128xbf16> -> vector<12x16x128xbf16>
    %25 = vector.extract_strided_slice %21 {offsets = [0, 1, 0], sizes = [12, 15, 128], strides = [1, 1, 1]} : vector<12x16x128xbf16> to vector<12x15x128xbf16>
    %26 = tpu.concatenate %25, %22 in 1 : vector<12x15x128xbf16>, vector<12x1x128xbf16> -> vector<12x16x128xbf16>
    %27 = vector.extract_strided_slice %24 {offsets = [0, 0, 0], sizes = [10, 16, 128], strides = [1, 1, 1]} : vector<12x16x128xbf16> to vector<10x16x128xbf16>
    %28 = vector.shape_cast %27 : vector<10x16x128xbf16> to vector<160x128xbf16>
    %29 = vector.extract_strided_slice %21 {offsets = [0, 0, 0], sizes = [10, 16, 128], strides = [1, 1, 1]} : vector<12x16x128xbf16> to vector<10x16x128xbf16>
    %30 = vector.shape_cast %29 : vector<10x16x128xbf16> to vector<160x128xbf16>
    %31 = vector.extract_strided_slice %26 {offsets = [0, 0, 0], sizes = [10, 16, 128], strides = [1, 1, 1]} : vector<12x16x128xbf16> to vector<10x16x128xbf16>
    %32 = vector.shape_cast %31 : vector<10x16x128xbf16> to vector<160x128xbf16>
    %33 = vector.extract_strided_slice %24 {offsets = [1, 0, 0], sizes = [10, 16, 128], strides = [1, 1, 1]} : vector<12x16x128xbf16> to vector<10x16x128xbf16>
    %34 = vector.shape_cast %33 : vector<10x16x128xbf16> to vector<160x128xbf16>
    %35 = vector.extract_strided_slice %21 {offsets = [1, 0, 0], sizes = [10, 16, 128], strides = [1, 1, 1]} : vector<12x16x128xbf16> to vector<10x16x128xbf16>
    %36 = vector.shape_cast %35 : vector<10x16x128xbf16> to vector<160x128xbf16>
    %37 = vector.extract_strided_slice %26 {offsets = [1, 0, 0], sizes = [10, 16, 128], strides = [1, 1, 1]} : vector<12x16x128xbf16> to vector<10x16x128xbf16>
    %38 = vector.shape_cast %37 : vector<10x16x128xbf16> to vector<160x128xbf16>
    %39 = vector.extract_strided_slice %24 {offsets = [2, 0, 0], sizes = [10, 16, 128], strides = [1, 1, 1]} : vector<12x16x128xbf16> to vector<10x16x128xbf16>
    %40 = vector.shape_cast %39 : vector<10x16x128xbf16> to vector<160x128xbf16>
    %41 = vector.extract_strided_slice %21 {offsets = [2, 0, 0], sizes = [10, 16, 128], strides = [1, 1, 1]} : vector<12x16x128xbf16> to vector<10x16x128xbf16>
    %42 = vector.shape_cast %41 : vector<10x16x128xbf16> to vector<160x128xbf16>
    %43 = vector.extract_strided_slice %26 {offsets = [2, 0, 0], sizes = [10, 16, 128], strides = [1, 1, 1]} : vector<12x16x128xbf16> to vector<10x16x128xbf16>
    %44 = vector.shape_cast %43 : vector<10x16x128xbf16> to vector<160x128xbf16>
    %45 = tpu.concatenate %28, %30, %32, %34, %36, %38, %40, %42, %44 in 1 : vector<160x128xbf16>, vector<160x128xbf16>, vector<160x128xbf16>, vector<160x128xbf16>, vector<160x128xbf16>, vector<160x128xbf16>, vector<160x128xbf16>, vector<160x128xbf16>, vector<160x128xbf16> -> vector<160x1152xbf16>
    %c0_12 = arith.constant 0 : index
    %c0_13 = arith.constant 0 : index
    %46 = vector.load %arg5[%c0_12, %c0_13] : memref<1152x128xbf16, #tpu.memory_space<vmem>>, vector<1152x128xbf16>
    %cst_14 = arith.constant dense<0.000000e+00> : vector<160x128xf32>
    %47 = tpu.matmul %45, %46, %cst_14 {dimension_numbers = #tpu.dot_dimension_numbers<[1], [0], [0], [1], [0, 0, 1, 1], [], []>} : vector<160x1152xbf16>, vector<1152x128xbf16>, vector<160x128xf32> -> vector<160x128xf32>
    %c0_15 = arith.constant 0 : index
    %c0_16 = arith.constant 0 : index
    %48 = vector.load %arg7[%c0_15, %c0_16] : memref<1x128xf32, #tpu.memory_space<vmem>>, vector<1x128xf32>
    %49 = vector.broadcast %48 : vector<1x128xf32> to vector<160x128xf32>
    %50 = arith.mulf %47, %49 : vector<160x128xf32>
    %c0_17 = arith.constant 0 : index
    %c0_18 = arith.constant 0 : index
    %51 = vector.load %arg8[%c0_17, %c0_18] : memref<1x128xf32, #tpu.memory_space<vmem>>, vector<1x128xf32>
    %52 = vector.broadcast %51 : vector<1x128xf32> to vector<160x128xf32>
    %53 = arith.addf %50, %52 : vector<160x128xf32>
    %cst_19 = arith.constant 0.000000e+00 : f32
    %54 = vector.broadcast %cst_19 : f32 to vector<160x128xf32>
    %55 = arith.maximumf %53, %54 : vector<160x128xf32>
    %56 = vector.shape_cast %55 : vector<160x128xf32> to vector<10x16x128xf32>
    %57 = tpu.iota {dimensions = array<i32: 0>} : vector<10x1x1xi32>
    %c1_i32 = arith.constant 1 : i32
    %58 = arith.subi %0, %c1_i32 : i32
    %59 = vector.broadcast %58 : i32 to vector<10x1x1xi32>
    %60 = arith.addi %57, %59 : vector<10x1x1xi32>
    %c0_i32_20 = arith.constant 0 : i32
    %61 = vector.broadcast %c0_i32_20 : i32 to vector<10x1x1xi32>
    %62 = arith.cmpi sge, %60, %61 : vector<10x1x1xi32>
    %c16_i32_21 = arith.constant 16 : i32
    %63 = vector.broadcast %c16_i32_21 : i32 to vector<10x1x1xi32>
    %64 = arith.cmpi slt, %60, %63 : vector<10x1x1xi32>
    %65 = arith.andi %62, %64 : vector<10x1x1xi1>
    %cst_22 = arith.constant 0.000000e+00 : f32
    %66 = vector.shape_cast %65 : vector<10x1x1xi1> to vector<10x1x1xi1>
    %67 = vector.broadcast %66 : vector<10x1x1xi1> to vector<10x16x128xi1>
    %68 = vector.broadcast %cst_22 : f32 to vector<10x16x128xf32>
    %69 = arith.select %67, %56, %68 : vector<10x16x128xi1>, vector<10x16x128xf32>
    %70 = arith.truncf %69 : vector<10x16x128xf32> to vector<10x16x128xbf16>
    %cst_23 = arith.constant 0.000000e+00 : bf16
    %71 = vector.broadcast %cst_23 : bf16 to vector<10x1x128xbf16>
    %72 = vector.extract_strided_slice %70 {offsets = [0, 0, 0], sizes = [10, 15, 128], strides = [1, 1, 1]} : vector<10x16x128xbf16> to vector<10x15x128xbf16>
    %73 = tpu.concatenate %71, %72 in 1 : vector<10x1x128xbf16>, vector<10x15x128xbf16> -> vector<10x16x128xbf16>
    %74 = vector.extract_strided_slice %70 {offsets = [0, 1, 0], sizes = [10, 15, 128], strides = [1, 1, 1]} : vector<10x16x128xbf16> to vector<10x15x128xbf16>
    %75 = tpu.concatenate %74, %71 in 1 : vector<10x15x128xbf16>, vector<10x1x128xbf16> -> vector<10x16x128xbf16>
    %76 = vector.extract_strided_slice %73 {offsets = [0, 0, 0], sizes = [8, 16, 128], strides = [1, 1, 1]} : vector<10x16x128xbf16> to vector<8x16x128xbf16>
    %77 = vector.shape_cast %76 : vector<8x16x128xbf16> to vector<128x128xbf16>
    %78 = vector.extract_strided_slice %70 {offsets = [0, 0, 0], sizes = [8, 16, 128], strides = [1, 1, 1]} : vector<10x16x128xbf16> to vector<8x16x128xbf16>
    %79 = vector.shape_cast %78 : vector<8x16x128xbf16> to vector<128x128xbf16>
    %80 = vector.extract_strided_slice %75 {offsets = [0, 0, 0], sizes = [8, 16, 128], strides = [1, 1, 1]} : vector<10x16x128xbf16> to vector<8x16x128xbf16>
    %81 = vector.shape_cast %80 : vector<8x16x128xbf16> to vector<128x128xbf16>
    %82 = vector.extract_strided_slice %73 {offsets = [1, 0, 0], sizes = [8, 16, 128], strides = [1, 1, 1]} : vector<10x16x128xbf16> to vector<8x16x128xbf16>
    %83 = vector.shape_cast %82 : vector<8x16x128xbf16> to vector<128x128xbf16>
    %84 = vector.extract_strided_slice %70 {offsets = [1, 0, 0], sizes = [8, 16, 128], strides = [1, 1, 1]} : vector<10x16x128xbf16> to vector<8x16x128xbf16>
    %85 = vector.shape_cast %84 : vector<8x16x128xbf16> to vector<128x128xbf16>
    %86 = vector.extract_strided_slice %75 {offsets = [1, 0, 0], sizes = [8, 16, 128], strides = [1, 1, 1]} : vector<10x16x128xbf16> to vector<8x16x128xbf16>
    %87 = vector.shape_cast %86 : vector<8x16x128xbf16> to vector<128x128xbf16>
    %88 = vector.extract_strided_slice %73 {offsets = [2, 0, 0], sizes = [8, 16, 128], strides = [1, 1, 1]} : vector<10x16x128xbf16> to vector<8x16x128xbf16>
    %89 = vector.shape_cast %88 : vector<8x16x128xbf16> to vector<128x128xbf16>
    %90 = vector.extract_strided_slice %70 {offsets = [2, 0, 0], sizes = [8, 16, 128], strides = [1, 1, 1]} : vector<10x16x128xbf16> to vector<8x16x128xbf16>
    %91 = vector.shape_cast %90 : vector<8x16x128xbf16> to vector<128x128xbf16>
    %92 = vector.extract_strided_slice %75 {offsets = [2, 0, 0], sizes = [8, 16, 128], strides = [1, 1, 1]} : vector<10x16x128xbf16> to vector<8x16x128xbf16>
    %93 = vector.shape_cast %92 : vector<8x16x128xbf16> to vector<128x128xbf16>
    %94 = tpu.concatenate %77, %79, %81, %83, %85, %87, %89, %91, %93 in 1 : vector<128x128xbf16>, vector<128x128xbf16>, vector<128x128xbf16>, vector<128x128xbf16>, vector<128x128xbf16>, vector<128x128xbf16>, vector<128x128xbf16>, vector<128x128xbf16>, vector<128x128xbf16> -> vector<128x1152xbf16>
    %c0_24 = arith.constant 0 : index
    %c0_25 = arith.constant 0 : index
    %95 = vector.load %arg6[%c0_24, %c0_25] : memref<1152x128xbf16, #tpu.memory_space<vmem>>, vector<1152x128xbf16>
    %cst_26 = arith.constant dense<0.000000e+00> : vector<128x128xf32>
    %96 = tpu.matmul %94, %95, %cst_26 {dimension_numbers = #tpu.dot_dimension_numbers<[1], [0], [0], [1], [0, 0, 1, 1], [], []>} : vector<128x1152xbf16>, vector<1152x128xbf16>, vector<128x128xf32> -> vector<128x128xf32>
    %c0_27 = arith.constant 0 : index
    %c0_28 = arith.constant 0 : index
    %97 = vector.load %arg9[%c0_27, %c0_28] : memref<1x128xf32, #tpu.memory_space<vmem>>, vector<1x128xf32>
    %98 = vector.broadcast %97 : vector<1x128xf32> to vector<128x128xf32>
    %99 = arith.mulf %96, %98 : vector<128x128xf32>
    %c0_29 = arith.constant 0 : index
    %c0_30 = arith.constant 0 : index
    %100 = vector.load %arg10[%c0_29, %c0_30] : memref<1x128xf32, #tpu.memory_space<vmem>>, vector<1x128xf32>
    %101 = vector.broadcast %100 : vector<1x128xf32> to vector<128x128xf32>
    %102 = arith.addf %99, %101 : vector<128x128xf32>
    %c0_31 = arith.constant 0 : index
    %c0_32 = arith.constant 0 : index
    %c0_33 = arith.constant 0 : index
    %c0_34 = arith.constant 0 : index
    %103 = vector.load %arg2[%c0_31, %c0_32, %c0_33, %c0_34] : memref<1x8x16x128xf32, #tpu.memory_space<vmem>>, vector<1x8x16x128xf32>
    %104 = vector.shape_cast %103 : vector<1x8x16x128xf32> to vector<8x16x128xf32>
    %105 = vector.shape_cast %104 : vector<8x16x128xf32> to vector<128x128xf32>
    %106 = arith.addf %102, %105 : vector<128x128xf32>
    %cst_35 = arith.constant 0.000000e+00 : f32
    %107 = vector.broadcast %cst_35 : f32 to vector<128x128xf32>
    %108 = arith.maximumf %106, %107 : vector<128x128xf32>
    %109 = vector.shape_cast %108 : vector<128x128xf32> to vector<8x16x128xf32>
    %c0_36 = arith.constant 0 : index
    %c0_37 = arith.constant 0 : index
    %c0_38 = arith.constant 0 : index
    %c0_39 = arith.constant 0 : index
    %110 = vector.load %arg11[%c0_36, %c0_37, %c0_38, %c0_39] : memref<1x8x16x128xf32, #tpu.memory_space<vmem>>, vector<1x8x16x128xf32>
    %111 = vector.shape_cast %110 : vector<1x8x16x128xf32> to vector<8x16x128xf32>
    %112 = vector.shape_cast %109 : vector<8x16x128xf32> to vector<1x8x16x128xf32>
    tpu.vector_store %arg11[%c0_36, %c0_37, %c0_38, %c0_39], %112 {strides = array<i32>} : memref<1x8x16x128xf32, #tpu.memory_space<vmem>>, vector<1x8x16x128xf32>,
    return
  }
  func.func @transform_0(%arg0: i32, %arg1: i32) -> (i32, i32, i32, i32) {
    %c0_i32 = arith.constant 0 : i32
    %c0_i32_0 = arith.constant 0 : i32
    %c0_i32_1 = arith.constant 0 : i32
    return %arg0, %arg1, %c0_i32, %c0_i32_0 : i32, i32, i32, i32
  }
  func.func @transform_1(%arg0: i32, %arg1: i32) -> (i32, i32, i32, i32) {
    %c4_i32 = arith.constant 4 : i32
    %0 = arith.muli %arg1, %c4_i32 : i32
    %c1_i32 = arith.constant 1 : i32
    %1 = arith.subi %0, %c1_i32 : i32
    %c0_i32 = arith.constant 0 : i32
    %2 = arith.maxsi %1, %c0_i32 : i32
    %c0_i32_0 = arith.constant 0 : i32
    %c0_i32_1 = arith.constant 0 : i32
    %c0_i32_2 = arith.constant 0 : i32
    return %arg0, %2, %c0_i32_0, %c0_i32_1 : i32, i32, i32, i32
  }
  func.func @transform_2(%arg0: i32, %arg1: i32) -> (i32, i32, i32, i32) {
    %c1_i32 = arith.constant 1 : i32
    %0 = arith.addi %arg1, %c1_i32 : i32
    %c4_i32 = arith.constant 4 : i32
    %1 = arith.muli %0, %c4_i32 : i32
    %c7_i32 = arith.constant 7 : i32
    %2 = arith.minsi %1, %c7_i32 : i32
    %c0_i32 = arith.constant 0 : i32
    %c0_i32_0 = arith.constant 0 : i32
    %c0_i32_1 = arith.constant 0 : i32
    return %arg0, %2, %c0_i32, %c0_i32_0 : i32, i32, i32, i32
  }
  func.func @transform_3(%arg0: i32, %arg1: i32) -> (i32, i32) {
    %c0_i32 = arith.constant 0 : i32
    %c0_i32_0 = arith.constant 0 : i32
    %c0_i32_1 = arith.constant 0 : i32
    return %c0_i32, %c0_i32_0 : i32, i32
  }
  func.func @transform_4(%arg0: i32, %arg1: i32) -> (i32, i32) {
    %c0_i32 = arith.constant 0 : i32
    %c0_i32_0 = arith.constant 0 : i32
    %c0_i32_1 = arith.constant 0 : i32
    return %c0_i32, %c0_i32_0 : i32, i32
  }
  func.func @transform_5(%arg0: i32, %arg1: i32) -> (i32, i32) {
    %c0_i32 = arith.constant 0 : i32
    %c0_i32_0 = arith.constant 0 : i32
    %c0_i32_1 = arith.constant 0 : i32
    return %c0_i32, %c0_i32_0 : i32, i32
  }
  func.func @transform_6(%arg0: i32, %arg1: i32) -> (i32, i32) {
    %c0_i32 = arith.constant 0 : i32
    %c0_i32_0 = arith.constant 0 : i32
    %c0_i32_1 = arith.constant 0 : i32
    return %c0_i32, %c0_i32_0 : i32, i32
  }
  func.func @transform_7(%arg0: i32, %arg1: i32) -> (i32, i32) {
    %c0_i32 = arith.constant 0 : i32
    %c0_i32_0 = arith.constant 0 : i32
    %c0_i32_1 = arith.constant 0 : i32
    return %c0_i32, %c0_i32_0 : i32, i32
  }
  func.func @transform_8(%arg0: i32, %arg1: i32) -> (i32, i32) {
    %c0_i32 = arith.constant 0 : i32
    %c0_i32_0 = arith.constant 0 : i32
    %c0_i32_1 = arith.constant 0 : i32
    return %c0_i32, %c0_i32_0 : i32, i32
  }
  func.func @transform_9(%arg0: i32, %arg1: i32) -> (i32, i32, i32, i32) {
    %c0_i32 = arith.constant 0 : i32
    %c0_i32_0 = arith.constant 0 : i32
    %c0_i32_1 = arith.constant 0 : i32
    return %arg0, %arg1, %c0_i32, %c0_i32_0 : i32, i32, i32, i32
  }
}

</mosaic_0001>

<bundles_post_ra>
// kernel: basic_block_forward.1
= control target key start
LH: loop header
LB: loop body
LE: loop exit
PB: predicated region body
PF: predicated region fallthrough
CT: control target
= control target key end

     0   :  { %s4531_s30 = smov 0   ;;  %s4533_s10 = smov 0   ;;  %s6200_s0 = inlined_call_operand.vmem [shape: f32[2,16,16,128], index: 0, kind: input, shape index: {}, may-alias: {0,1,2}]   ;;  %s6201_s1 = inlined_call_operand.vmem [shape: f32[2,16,16,128], index: 1, kind: input, shape index: {}, may-alias: {0,1,2}]   ;;  %s6202_s2 = inlined_call_operand.vmem [shape: f32[2,16,16,128], index: 2, kind: input, shape index: {}, may-alias: {0,1,2}]   ;;  %s6203_s3 = inlined_call_operand.vmem [shape: bf16[1152,128], index: 3, kind: input, shape index: {}]   ;;  %s6204_s4 = inlined_call_operand.vmem [shape: bf16[1152,128], index: 4, kind: input, shape index: {}]   ;;  %s6205_s5 = inlined_call_operand.vmem [shape: f32[1,128], index: 5, kind: input, shape index: {}]   ;;  %s6206_s6 = inlined_call_operand.vmem [shape: f32[1,128], index: 6, kind: input, shape index: {}]   ;;  %s6207_s7 = inlined_call_operand.vmem [shape: f32[1,128], index: 7, kind: input, shape index: {}]   ;;  %s6208_s8 = inlined_call_operand.vmem [shape: f32[1,128], index: 8, kind: input, shape index: {}]   ;;  %s6209_s9 = inlined_call_operand.vmem [shape: f32[2,16,16,128], index: 9, kind: output, shape index: {}]  }
   0x1   :  { %s4535_s11 = smov 0   ;;  %s4537_s12 = smov 0  }
   0x2   :  { %s4539_s13 = smov 0  }
   0x3 LB: > { %s28_s14 = sadd.s32 1, %s4471_s11  ;;  %s31_s15 = sadd.s32 1, %s4475_s12  ;;  %s4479_s13 = sphi %s4539_s13, %s19_s13   ;;  %s4475_s12 = sphi %s4537_s12, %s6269_s12   ;;  %s4471_s11 = sphi %s4535_s11, %s6268_s11   ;;  %s4467_s10 = sphi %s4533_s10, %s6267_s10   ;;  %s4463_s30 = sphi %s4531_s30, %s6266_s30  }
   0x4   : > { %p29_p0 = scmp.ge.s32.totalorder %s28_s14, 2  ;;  %p3614_p1 = scmp.ge.s32.totalorder %s4479_s13, 1 }
   0x5   : > { %p377_p2 = scmp.lt.s32.totalorder %s4479_s13, 5 }
   0x6   : > { %s6271_s14 = smov (%p29_p0, %s28_s14), 0  ;;  %s6273_s15 = smov (!%p29_p0, %s31_s15), %s4475_s12 }
   0x7   : > { %p378_p3 = pnand %p3614_p1, %p377_p2  ;;  %p33_p4 = scmp.ge.s32.totalorder %s6273_s15, 2 }
   0x9   : > { %s6275_s15 = smov (%p33_p4, %s6273_s15), 0  ;;  %381 = sbr.rel (%p378_p3) target bundleno = 1087 (0x43f), region = 56 }
   0xe   : > { %v4228_v0 = vld [vmem:[%s6203_s3 + $0x38] sm:$0xff]  ;;  %s4570_s20 = sshll.u32 %s4463_s30, 3  ;;  %p452_p5 = scmp.lt.s32.totalorder %s4467_s10, 1  ;;  %v4227_v2 = vld [vmem:[%s6203_s3 + $0x30] sm:$0xff]  ;;  %v4226_v4 = vld [vmem:[%s6203_s3 + $0x28] sm:$0xff]  ;;  %vm814_vm9 = vcmask 1040384  }
   0xf   : > { %v4236_v1 = vld [vmem:[%s6203_s3 + $0x78] sm:$0xff]  ;;  %p454_p6 = scmp.lt.s32.totalorder %s4570_s20, 15  ;;  %s3619_s21 = sshll.u32 %s4463_s30, 2  ;;  %1468 = vmatpush.bf16.msra.mxu0 %v4228_v0  ;;  %v4235_v3 = vld [vmem:[%s6203_s3 + $0x70] sm:$0xff]  ;;  %v4234_v6 = vld [vmem:[%s6203_s3 + $0x68] sm:$0xff] }
  0x10   : > { %1527 = vmatpush.bf16.msra.mxu1 %v4236_v1  ;;  %s6277_s10 = smov (!%p452_p5, %s4467_s10), 1  ;;  %4365 = vmatpush.bf16.msra.mxu3 %v4236_v1  ;;  %s3620_s28 = sadd.s32 4294967295, %s3619_s21  ;;  %v4589_v5 = vld [vmem:[%s6203_s3 + $0xb8] sm:$0xff]  ;;  %v4225_v7 = vld [vmem:[%s6203_s3 + $0x20] sm:$0xff]  ;;  %v4223_v16 = vld [vmem:[%s6203_s3 + $0x10] sm:$0xff] }
  0x11   : > { %s455_s26 = scalar_select %p454_p6, %s4570_s20, 15  ;;  %4373 = vmatpush.bf16.msra.mxu2 %v4589_v5  ;;  %v4233_v8 = vld [vmem:[%s6203_s3 + $0x60] sm:$0xff]  ;;  %v4224_v12 = vld [vmem:[%s6203_s3 + $0x18] sm:$0xff]  ;;  %v4231_v18 = vld [vmem:[%s6203_s3 + $0x50] sm:$0xff]  ;;  %vm815_vm10 = vsmask.f32 256 }
  0x12   : > { %s4581_s27 = sshll.u32 %s6277_s10, 5  ;;  %p464_p7 = scmp.gt.s32.totalorder %s3620_s28, 0  ;;  %v4232_v13 = vld [vmem:[%s6203_s3 + $0x58] sm:$0xff]  ;;  %v4651_v21 = vld [vmem:[%s6203_s3 + $0xb0] sm:$0xff]  ;;  %v4659_v23 = vld [vmem:[%s6203_s3 + $0xa8] sm:$0xff] }
  0x13   : > { %s3616_s30 = sshll.u32 %s455_s26, 1  ;;  %1469 = vmatpush.bf16.msra.mxu0 %v4227_v2  ;;  %s4220_s23 = sadd.s32 4, %s3619_s21  ;;  %v4222_v32 = vld [vmem:[%s6203_s3 + $0x8] sm:$0xff]  ;;  %v4681_v43 = vld [vmem:[%s6203_s3 + $0xa0] sm:$0xff]  ;;  %v4252_v54 = vld [vmem:[%s6203_s3 + $0xf8] sm:$0xff] }
  0x14   : > { %1528 = vmatpush.bf16.msra.mxu1 %v4235_v3  ;;  %s4595_s10 = sadd.s32 %s4581_s27, %s3616_s30  ;;  %4366 = vmatpush.bf16.msra.mxu3 %v4235_v3  ;;  %p483_p8 = scmp.lt.s32.totalorder %s4220_s23, 7  ;;  %v4230_v33 = vld [vmem:[%s6203_s3 + $0x48] sm:$0xff]  ;;  %v4221_v44 = vld [vmem:[%s6203_s3] sm:$0xff]  ;;  %v4701_v55 = vld [vmem:[%s6203_s3 + $0x98] sm:$0xff] }
  0x15   : > { %s3618_s24 = sshll.u32 %s4595_s10, 3  ;;  %s6279_s28 = smov (!%p464_p7, %s3620_s28), 0  ;;  %4374 = vmatpush.bf16.msra.mxu2 %v4651_v21  ;;  %v4229_v45 = vld [vmem:[%s6203_s3 + $0x40] sm:$0xff]  ;;  %vm4706_vm13 = vmand %vm814_vm9, %vm815_vm10  ;;  %v4251_v1 = vld [vmem:[%s6203_s3 + $0xf0] sm:$0xff] }
  0x16   : > { %s4604_s29 = scalar_lea.vmem %s6200_s0, %s3618_s24  ;;  %s6281_s23 = smov (!%p483_p8, %s4220_s23), 7 }
  0x17   : > { %1470 = vmatpush.bf16.msra.mxu0 %v4226_v4  ;;  %s3621_s18 = sshll.u32 %s6279_s28, 1  ;;  %s3635_s19 = sadd.s32 4294967294, %s4570_s20  ;;  %v527_v14 = vld [vmem:[%s4604_s29 + $0x50] sm:$0xff]  ;;  %v528_v15 = vld [vmem:[%s4604_s29 + $0x58] sm:$0xff]  ;;  %v529_v60 = vld [vmem:[%s4604_s29 + $0x60] sm:$0xff] }
  0x18   : > { %1529 = vmatpush.bf16.msra.mxu1 %v4234_v6  ;;  %4367 = vmatpush.bf16.msra.mxu3 %v4234_v6  ;;  %p469_p9 = scmp.lt.s32.totalorder %s3621_s18, 15  ;;  %s3626_s22 = sshll.u32 %s6281_s23, 1  ;;  %v4613_v9 = vstv %s3635_s19  ;;  %v530_v61 = vld [vmem:[%s4604_s29 + $0x68] sm:$0xff]  ;;  %v519_v2 = vld [vmem:[%s4604_s29 + $0x10] sm:$0xff]  ;;  %v520_v3 = vld [vmem:[%s4604_s29 + $0x18] sm:$0xff] }
  0x19   : > { %p488_p10 = scmp.lt.s32.totalorder %s3626_s22, 15  ;;  %v545_v10 = vadd.s32 7, %v4613_v9  ;;  %v539_v11 = vadd.s32 1, %v4613_v9  ;;  %vm550_vm0 = vcmp.ge.s32.totalorder %v4613_v9, 0  ;;  %vm562_vm1 = vcmp.lt.s32.totalorder %v4613_v9, 16  ;;  %4375 = vmatpush.bf16.msra.mxu2 %v4659_v23  ;;  %v517_v4 = vld [vmem:[%s4604_s29] sm:$0xff] }
  0x1a   : > { %s6283_s18 = smov (!%p469_p9, %s3621_s18), 15  ;;  %vm4633_vm7 = vmand %vm550_vm0, %vm562_vm1  ;;  %v546_v38 = vadd.s32 8, %v4613_v9  ;;  %v540_v49 = vadd.s32 2, %v4613_v9  ;;  %v541_v59 = vadd.s32 3, %v4613_v9  ;;  %v518_v6 = vld [vmem:[%s4604_s29 + $0x8] sm:$0xff] }
  0x1b   : > { %1471 = vmatpush.bf16.msra.mxu0 %v4225_v7  ;;  %s6285_s22 = smov (!%p488_p10, %s3626_s22), 15  ;;  %vm557_vm2 = vcmp.ge.s32.totalorder %v545_v10, 0  ;;  %vm569_vm3 = vcmp.lt.s32.totalorder %v545_v10, 16  ;;  %vm551_vm4 = vcmp.ge.s32.totalorder %v539_v11, 0  ;;  %vm563_vm5 = vcmp.lt.s32.totalorder %v539_v11, 16  ;;  %s3622_s23 = sshll.u32 %s6283_s18, 1 }
  0x1c   : > { %1530 = vmatpush.bf16.msra.mxu1 %v4233_v8  ;;  %4368 = vmatpush.bf16.msra.mxu3 %v4233_v8  ;;  %vm581_vm6 = vmand %vm557_vm2, %vm569_vm3  ;;  %s473_s21 = sadd.s32 %s3622_s23, %s4581_s27  ;;  %s3627_s19 = sshll.u32 %s6285_s22, 1  ;;  %vm558_vm11 = vcmp.ge.s32.totalorder %v546_v38, 0  ;;  %vm570_vm12 = vcmp.lt.s32.totalorder %v546_v38, 16  ;;  %vm552_vm15 = vcmp.ge.s32.totalorder %v540_v49, 0  ;;  %vm564_vm0 = vcmp.lt.s32.totalorder %v540_v49, 16  ;;  %v4743_v7 = vld [vmem:[%s6203_s3 + $0x90] sm:$0xff] }
  0x1d   : > { %s3624_s18 = sshll.u32 %s473_s21, 3  ;;  %s4641_s16 = sadd.s32 %s3627_s19, %s4581_s27  ;;  %v624_v19 = vsel %vm581_vm6, %v527_v14, 0.0  ;;  %vm4644_vm8 = vmand %vm551_vm4, %vm563_vm5  ;;  %v625_v22 = vsel %vm581_vm6, %v528_v15, 0.0  ;;  %4376 = vmatpush.bf16.msra.mxu2 %v4681_v43  ;;  %vm553_vm1 = vcmp.ge.s32.totalorder %v541_v59, 0  ;;  %vm565_vm2 = vcmp.lt.s32.totalorder %v541_v59, 16  ;;  %v522_v59 = vld [vmem:[%s4604_s29 + $0x28] sm:$0xff] }
  0x1e   : > { %s475_s17 = scalar_lea.vmem %s6201_s1, %s3624_s18  ;;  %v648_v29 = vpack.c.bf16 %v624_v19, %v624_v19  ;;  %v649_v36 = vpack.c.bf16 %v625_v22, %v625_v22  ;;  %vm4718_vm14 = vmand %vm558_vm11, %vm570_vm12  ;;  %v4758_v19 = vld [vmem:[%s6203_s3 + $0x88] sm:$0xff]  ;;  %vm865_vm5 = vcmask 1047552   ;;  %vm866_vm6 = vsmask.f32 7424  ;;  %s3629_s18 = sshll.u32 %s4641_s16, 3 }
  0x1f   : > { %1472 = vmatpush.bf16.msra.mxu0 %v4224_v12  ;;  %v513_v24 = vld [vmem:[%s475_s17] sm:$0xff]  ;;  %v514_v25 = vld [vmem:[%s475_s17 + $0x8] sm:$0xff]  ;;  %v515_v26 = vld [vmem:[%s475_s17 + $0x10] sm:$0xff]  ;;  %v626_v11 = vsel %vm4718_vm14, %v529_v60, 0.0  ;;  %v627_v12 = vsel %vm4718_vm14, %v530_v61, 0.0  ;;  %s5031_s19 = scalar_lea.vmem %s6202_s2, %s3629_s18  ;;  %s3924_s16 = sadd.s32 4294967295, %s4570_s20 }
  0x20   : > { %1531 = vmatpush.bf16.msra.mxu1 %v4232_v13  ;;  %4369 = vmatpush.bf16.msra.mxu3 %v4232_v13  ;;  %v610_v27 = vsel %vm4633_vm7, %v513_v24, 0.0  ;;  %v611_v28 = vsel %vm4633_vm7, %v514_v25, 0.0  ;;  %v516_v30 = vld [vmem:[%s475_s17 + $0x18] sm:$0xff]  ;;  %v612_v31 = vsel %vm4644_vm8, %v515_v26, 0.0  ;;  %v696_v47 = vunpack.c.l.b16 %v648_v29  ;;  %vm577_vm3 = vmand %vm553_vm1, %vm565_vm2  ;;  %v4249_v29 = vld [vmem:[%s6203_s3 + $0xe0] sm:$0xff]  ;;  %s6108_s21 = scalar_lea.vmem %s6209_s9, %s3618_s24 }
  0x21   : > { %v634_v34 = vpack.c.bf16 %v610_v27, %v610_v27  ;;  %v635_v35 = vpack.c.bf16 %v611_v28, %v611_v28  ;;  %v613_v37 = vsel %vm4644_vm8, %v516_v30, 0.0  ;;  %v636_v41 = vpack.c.bf16 %v612_v31, %v612_v31  ;;  %4377 = vmatpush.bf16.msra.mxu2 %v4701_v55  ;;  %vm576_vm4 = vmand %vm552_vm15, %vm564_vm0 }
  0x22   : > { %v637_v42 = vpack.c.bf16 %v613_v37, %v613_v37  ;;  %v697_v48 = vunpack.c.l.b16 %v649_v36  ;;  %v616_v8 = vsel %vm577_vm3, %v519_v2, 0.0  ;;  %v617_v10 = vsel %vm577_vm3, %v520_v3, 0.0  ;;  %vm4785_vm9 = vmand %vm865_vm5, %vm866_vm6 }
  0x23   : > { %1473 = vmatpush.bf16.msra.mxu0 %v4223_v16  ;;  %v682_v39 = vunpack.c.l.b16 %v634_v34  ;;  %v683_v40 = vunpack.c.l.b16 %v635_v35  ;;  %v684_v52 = vunpack.c.l.b16 %v636_v41  ;;  %v640_v13 = vpack.c.bf16 %v616_v8, %v616_v8  ;;  %v4250_v16 = vld [vmem:[%s6203_s3 + $0xe8] sm:$0xff] }
  0x24   : > { %1532 = vmatpush.bf16.msra.mxu1 %v4231_v18  ;;  %4370 = vmatpush.bf16.msra.mxu3 %v4231_v18  ;;  %v685_v53 = vunpack.c.l.b16 %v637_v42  ;;  %v4710_v58 = vpack.c.b16 %v697_v48, %v696_v47  ;;  %v641_v14 = vpack.c.bf16 %v617_v10, %v617_v10  ;;  %v614_v17 = vsel %vm576_vm4, %v517_v4, 0.0  ;;  %v531_v47 = vld [vmem:[%s4604_s29 + $0x70] sm:$0xff]  ;;  %v532_v48 = vld [vmem:[%s4604_s29 + $0x78] sm:$0xff]  ;;  %v4246_v4 = vld [vmem:[%s6203_s3 + $0xc8] sm:$0xff] }
  0x25   : > { %v4689_v46 = vpack.c.b16 %v683_v40, %v682_v39  ;;  %v615_v18 = vsel %vm576_vm4, %v518_v6, 0.0  ;;  %4378 = vmatpush.bf16.msra.mxu2 %v4743_v7  ;;  %v688_v20 = vunpack.c.l.b16 %v640_v13  ;;  %v650_v24 = vpack.c.bf16 %v626_v11, %v626_v11  ;;  %v4248_v40 = vld [vmem:[%s6203_s3 + $0xd8] sm:$0xff]  ;;  %v4245_v13 = vld [vmem:[%s6203_s3 + $0xc0] sm:$0xff] }
  0x26   : > { %v4724_v0 = vpack.c.b16 %v685_v53, %v684_v52  ;;  %v689_v22 = vunpack.c.l.b16 %v641_v14  ;;  %v651_v25 = vpack.c.bf16 %v627_v12, %v627_v12  ;;  %v638_v30 = vpack.c.bf16 %v614_v17, %v614_v17 }
  0x27   : > { %1474 = vmatpush.bf16.msra.mxu0 %v4222_v32  ;;  %v719_v50 = vshrl.u32 %v4689_v46, 16  ;;  %v722_v51 = vshll.u32 %v4689_v46, 16  ;;  %v639_v31 = vpack.c.bf16 %v615_v18, %v615_v18  ;;  %v4774_v32 = vld [vmem:[%s6203_s3 + $0x80] sm:$0xff]  ;;  %v698_v35 = vunpack.c.l.b16 %v650_v24 }
  0x28   : > { %1533 = vmatpush.bf16.msra.mxu1 %v4230_v33  ;;  %4371 = vmatpush.bf16.msra.mxu3 %v4230_v33  ;;  %v726_v15 = vshrl.u32 %v4724_v0, 16  ;;  %v4761_v26 = vpack.c.b16 %v689_v22, %v688_v20  ;;  %v729_v28 = vshll.u32 %v4724_v0, 16  ;;  %v699_v36 = vunpack.c.l.b16 %v651_v25 }
  0x29   : > { %v721_v56 = vrot.slane %v719_v50, 7  ;;  %4379 = vmatpush.bf16.msra.mxu2 %v4758_v19  ;;  %v686_v38 = vunpack.c.l.b16 %v638_v30  ;;  %v687_v39 = vunpack.c.l.b16 %v639_v31  ;;  %v543_v24 = vadd.s32 5, %v4613_v9 }
  0x2a   : > { %v728_v27 = vrot.slane %v726_v15, 7  ;;  %v740_v33 = vshrl.u32 %v4761_v26, 16  ;;  %v743_v34 = vshll.u32 %v4761_v26, 16 }
  0x2b   : > { %1475 = vmatpush.bf16.msra.mxu0 %v4221_v44  ;;  %v724_v63 = vor.u32 %v722_v51, %v721_v56  ;;  %v542_v44 = vadd.s32 4, %v4613_v9  ;;  %v521_v56 = vld [vmem:[%s4604_s29 + $0x20] sm:$0xff]  ;;  %vm555_vm15 = vcmp.ge.s32.totalorder %v543_v24, 0  ;;  %vm567_vm0 = vcmp.lt.s32.totalorder %v543_v24, 16 }
  0x2c   : > { %1534 = vmatpush.bf16.msra.mxu1 %v4229_v45  ;;  %4372 = vmatpush.bf16.msra.mxu3 %v4229_v45  ;;  %v731_v37 = vor.u32 %v729_v28, %v728_v27  ;;  %v4794_v45 = vpack.c.b16 %v699_v36, %v698_v35  ;;  %v523_v27 = vld [vmem:[%s4604_s29 + $0x30] sm:$0xff]  ;;  %vm579_vm1 = vmand %vm555_vm15, %vm567_vm0 }
  0x2d   : > { %4380 = vmatpush.bf16.msra.mxu2 %v4774_v32  ;;  %vm554_vm11 = vcmp.ge.s32.totalorder %v542_v44, 0  ;;  %vm566_vm12 = vcmp.lt.s32.totalorder %v542_v44, 16  ;;  %v620_v30 = vsel %vm579_vm1, %v523_v27, 0.0 }
  0x2e   : > { %v4812_v53 = vsel %vm4706_vm13, 0, %v731_v37  ;;  %vm578_vm14 = vmand %vm554_vm11, %vm566_vm12  ;;  %v778_v24 = vshll.u32 %v4794_v45, 16  ;;  %v775_v27 = vshrl.u32 %v4794_v45, 16 }
  0x2f   : > { %1586 = vmatpush.bf16.msrb.mxu0 %v4589_v5  ;;  %1535 = vmatmul.bf16.vlgmr.msra.gmra.mxu1 %v4689_v46  ;;  %v817_v5 = vsel %vm4706_vm13, 0, %v724_v63  ;;  %v618_v60 = vsel %vm578_vm14, %v521_v56, 0.0  ;;  %v619_v61 = vsel %vm578_vm14, %v522_v59, 0.0  ;;  %v526_v56 = vld [vmem:[%s4604_s29 + $0x48] sm:$0xff] }
  0x30   : > { %1645 = vmatpush.bf16.msrb.mxu3 %v4252_v54  ;;  %1476 = vmatmul.bf16.vlgmr.msra.gmra.mxu0 %v817_v5  ;;  %v4814_v54 = vpack.c.b16 %v687_v39, %v686_v38  ;;  %v642_v62 = vpack.c.bf16 %v618_v60, %v618_v60  ;;  %v643_v63 = vpack.c.bf16 %v619_v61, %v619_v61  ;;  %v742_v38 = vrot.slane %v740_v33, 7 }
  0x31   : > { %1570 = vmatmul.bf16.vlgmr.msra.gmra.mxu3 %v4710_v58 }
  0x32   : > { %v733_v3 = vshrl.u32 %v4814_v54, 16  ;;  %v691_v5 = vunpack.c.l.b16 %v643_v63  ;;  %v736_v12 = vshll.u32 %v4814_v54, 16  ;;  %v745_v44 = vor.u32 %v743_v34, %v742_v38 }
  0x33   : > { %1587 = vmatpush.bf16.msrb.mxu0 %v4651_v21  ;;  %v547_v21 = vadd.s32 9, %v4613_v9 }
  0x34   : > { %1646 = vmatpush.bf16.msrb.mxu3 %v4251_v1  ;;  %v735_v11 = vrot.slane %v733_v3, 7 }
  0x35   : > { %vm559_vm7 = vcmp.ge.s32.totalorder %v547_v21, 0  ;;  %vm571_vm8 = vcmp.lt.s32.totalorder %v547_v21, 16 }
  0x36   : > { %vm4799_vm10 = vmand %vm559_vm7, %vm571_vm8  ;;  %v738_v20 = vor.u32 %v736_v12, %v735_v11 }
  0x37   : > { %1588 = vmatpush.bf16.msrb.mxu0 %v4659_v23  ;;  %v835_v23 = vrot.slane %v743_v34, 1  ;;  %v628_v1 = vsel %vm4799_vm10, %v531_v47, 0.0  ;;  %v629_v2 = vsel %vm4799_vm10, %v532_v48, 0.0  ;;  %v544_v48 = vadd.s32 6, %v4613_v9 }
  0x38   : > { %1647 = vmatpush.bf16.msrb.mxu3 %v4250_v16  ;;  %v652_v6 = vpack.c.bf16 %v628_v1, %v628_v1  ;;  %v653_v8 = vpack.c.bf16 %v629_v2, %v629_v2 }
  0x39   : > { %v836_v42 = vor.u32 %v835_v23, %v740_v33  ;;  %vm556_vm2 = vcmp.ge.s32.totalorder %v544_v48, 0  ;;  %vm568_vm3 = vcmp.lt.s32.totalorder %v544_v48, 16  ;;  %v4878_v33 = vsel %vm4706_vm13, 0, %v745_v44 }
  0x3a   : > { %v701_v17 = vunpack.c.l.b16 %v653_v8  ;;  %vm580_vm4 = vmand %vm556_vm2, %vm568_vm3 }
  0x3b   : > { %1589 = vmatpush.bf16.msrb.mxu0 %v4681_v43  ;;  %v4247_v43 = vld [vmem:[%s6203_s3 + $0xd0] sm:$0xff]  ;;  %v4808_v52 = vsel %vm4785_vm9, %v836_v42, 0  ;;  %v623_v59 = vsel %vm580_vm4, %v526_v56, 0.0 }
  0x3c   : > { %1648 = vmatpush.bf16.msrb.mxu3 %v4249_v29  ;;  %6226 = vst [vmem:[#allocation2_spill] sm:$0xff] %v4808_v52  ;;  %1609 = vmatmul.bf16.vlgmr.msra.gmra.mxu2 %v4808_v52  ;;  %v524_v29 = vld [vmem:[%s4604_s29 + $0x38] sm:$0xff]  ;;  %v647_v61 = vpack.c.bf16 %v623_v59, %v623_v59 }
  0x3d   : > { %v621_v31 = vsel %vm579_vm1, %v524_v29, 0.0  ;;  %v845_v29 = vrot.slane %v778_v24, 1 }
  0x3e   : > { %v645_v35 = vpack.c.bf16 %v621_v31, %v621_v31  ;;  %v695_v63 = vunpack.c.l.b16 %v647_v61 }
  0x3f   : > { %1540 = vmatmul.bf16.gmra.mxu1 %v4724_v0  ;;  %1590 = vmatpush.bf16.msrb.mxu0 %v4701_v55  ;;  %v690_v55 = vunpack.c.l.b16 %v642_v62  ;;  %v846_v31 = vor.u32 %v845_v29, %v775_v27  ;;  %v4268_v29 = vld [vmem:[%s6203_s3 + $0x178] sm:$0xff] }
  0x40   : > { %1649 = vmatpush.bf16.msrb.mxu3 %v4248_v40  ;;  %1481 = vmatmul.bf16.gmra.mxu0 %v4812_v53  ;;  %v693_v23 = vunpack.c.l.b16 %v645_v35 }
  0x41   : > { %1575 = vmatmul.bf16.gmra.mxu3 %v4794_v45  ;;  %v4832_v10 = vpack.c.b16 %v691_v5, %v690_v55  ;;  %v4920_v35 = vsel %vm4785_vm9, %v846_v31, 0  ;;  %1763 = vmatpush.bf16.msrb.mxu1 %v4268_v29 }
  0x43   : > { %1591 = vmatpush.bf16.msrb.mxu0 %v4743_v7  ;;  %v747_v14 = vshrl.u32 %v4832_v10, 16  ;;  %v750_v16 = vshll.u32 %v4832_v10, 16  ;;  %v700_v7 = vunpack.c.l.b16 %v652_v6 }
  0x44   : > { %1650 = vmatpush.bf16.msrb.mxu3 %v4247_v43  ;;  %v525_v43 = vld [vmem:[%s4604_s29 + $0x40] sm:$0xff] }
  0x45   : > { %v837_v18 = vrot.slane %v750_v16, 1  ;;  %v4847_v25 = vpack.c.b16 %v701_v17, %v700_v7  ;;  %v622_v34 = vsel %vm580_vm4, %v525_v43, 0.0  ;;  %v749_v2 = vrot.slane %v747_v14, 7 }
  0x46   : > { %v646_v60 = vpack.c.bf16 %v622_v34, %v622_v34  ;;  %v777_v43 = vrot.slane %v775_v27, 7  ;;  %v4257_v27 = vld [vmem:[%s6203_s3 + $0x120] sm:$0xff] }
  0x47   : > { %1592 = vmatpush.bf16.msrb.mxu0 %v4758_v19  ;;  %v838_v22 = vor.u32 %v837_v18, %v747_v14  ;;  %v4855_v19 = vsel %vm4706_vm13, 0, %v738_v20  ;;  %v752_v6 = vor.u32 %v750_v16, %v749_v2  ;;  %v768_v14 = vshrl.u32 %v4710_v58, 16 }
  0x48   : > { %1651 = vmatpush.bf16.msrb.mxu3 %v4246_v4  ;;  %v694_v62 = vunpack.c.l.b16 %v646_v60  ;;  %v785_v38 = vshll.u32 %v4847_v25, 16  ;;  %v780_v56 = vor.u32 %v778_v24, %v777_v43  ;;  %v4284_v24 = vld [vmem:[%s6203_s3 + $0x1f8] sm:$0xff]  ;;  %v4282_v43 = vld [vmem:[%s6203_s3 + $0x1e8] sm:$0xff] }
  0x49   : > { %v4851_v21 = vsel %vm4785_vm9, %v838_v22, 0 }
  0x4a   : > { %v4886_v1 = vpack.c.b16 %v695_v63, %v694_v62  ;;  %v4945_v60 = vsel %vm4706_vm13, 0, %v780_v56  ;;  %v4260_v62 = vld [vmem:[%s6203_s3 + $0x138] sm:$0xff] }
  0x4b   : > { %1593 = vmatpush.bf16.msrb.mxu0 %v4774_v32  ;;  %v644_v32 = vpack.c.bf16 %v620_v30, %v620_v30  ;;  %v4256_v56 = vld [vmem:[%s6203_s3 + $0x118] sm:$0xff] }
  0x4c   : > { %1652 = vmatpush.bf16.msrb.mxu3 %v4245_v13  ;;  %1614 = vmatmul.bf16.gmra.mxu2 %v4851_v21  ;;  %v761_v4 = vshrl.u32 %v4886_v1, 16  ;;  %v764_v55 = vshll.u32 %v4886_v1, 16  ;;  %v771_v13 = vshll.u32 %v4710_v58, 16 }
  0x4d   : > { %v692_v36 = vunpack.c.l.b16 %v644_v32 }
  0x4e   : > { %v841_v5 = vrot.slane %v764_v55, 1  ;;  %v843_v16 = vrot.slane %v771_v13, 1  ;;  %v763_v30 = vrot.slane %v761_v4, 7 }
  0x4f   : > { %1545 = vmatmul.bf16.gmra.mxu1 %v4814_v54  ;;  %v4863_v37 = vpack.c.b16 %v693_v23, %v692_v36  ;;  %v770_v23 = vrot.slane %v768_v14, 7  ;;  %1704 = vmatpush.bf16.msra.mxu0 %v4260_v62  ;;  %v4273_v62 = vld [vmem:[%s6203_s3 + $0x1a0] sm:$0xff] }
  0x50   : > { %1486 = vmatmul.bf16.gmra.mxu0 %v4855_v19  ;;  %v842_v8 = vor.u32 %v841_v5, %v761_v4  ;;  %v844_v17 = vor.u32 %v843_v16, %v768_v14  ;;  %v766_v32 = vor.u32 %v764_v55, %v763_v30  ;;  %v4259_v5 = vld [vmem:[%s6203_s3 + $0x130] sm:$0xff]  ;;  %1881 = vmatpush.bf16.msra.mxu3 %v4284_v24 }
  0x51   : > { %1580 = vmatmul.bf16.gmra.mxu3 %v4847_v25  ;;  %v754_v39 = vshrl.u32 %v4863_v37, 16  ;;  %v757_v40 = vshll.u32 %v4863_v37, 16  ;;  %v4275_v30 = vld [vmem:[%s6203_s3 + $0x1b0] sm:$0xff] }
  0x52   : > { %v4892_v11 = vsel %vm4785_vm9, %v842_v8, 0  ;;  %v4906_v20 = vsel %vm4785_vm9, %v844_v17, 0  ;;  %v4924_v36 = vsel %vm4706_vm13, 0, %v766_v32  ;;  %v4276_v17 = vld [vmem:[%s6203_s3 + $0x1b8] sm:$0xff]  ;;  %v4255_v24 = vld [vmem:[%s6203_s3 + $0x110] sm:$0xff] }
  0x53   : > { %v839_v42 = vrot.slane %v757_v40, 1  ;;  %v756_v7 = vrot.slane %v754_v39, 7  ;;  %1705 = vmatpush.bf16.msra.mxu0 %v4259_v5  ;;  %1822 = vmatpush.bf16.msrb.mxu2 %v4276_v17 }
  0x55   : > { %v840_v47 = vor.u32 %v839_v42, %v754_v39  ;;  %v759_v18 = vor.u32 %v757_v40, %v756_v7  ;;  %v782_v39 = vshrl.u32 %v4847_v25, 16  ;;  %v847_v40 = vrot.slane %v785_v38, 1 }
  0x56   : > { %v773_v42 = vor.u32 %v771_v13, %v770_v23  ;;  %v4258_v13 = vld [vmem:[%s6203_s3 + $0x128] sm:$0xff]  ;;  %v4283_v23 = vld [vmem:[%s6203_s3 + $0x1f0] sm:$0xff] }
  0x57   : > { %v4874_v49 = vsel %vm4785_vm9, %v840_v47, 0  ;;  %v4910_v22 = vsel %vm4706_vm13, 0, %v759_v18  ;;  %v848_v44 = vor.u32 %v847_v40, %v782_v39  ;;  %v784_v55 = vrot.slane %v782_v39, 7  ;;  %1706 = vmatpush.bf16.msra.mxu0 %v4258_v13  ;;  %1823 = vmatpush.bf16.msrb.mxu2 %v4275_v30  ;;  %v4265_v13 = vld [vmem:[%s6203_s3 + $0x160] sm:$0xff]  ;;  %v4280_v30 = vld [vmem:[%s6203_s3 + $0x1d8] sm:$0xff] }
  0x58   : > { %v4938_v48 = vsel %vm4706_vm13, 0, %v773_v42  ;;  %v829_v39 = vrot.slane %v722_v51, 1  ;;  %1882 = vmatpush.bf16.msra.mxu3 %v4283_v23  ;;  %v4267_v42 = vld [vmem:[%s6203_s3 + $0x170] sm:$0xff]  ;;  %v548_v51 = vadd.s32 10, %v4613_v9 }
  0x59   : > { %v4934_v47 = vsel %vm4785_vm9, %v848_v44, 0  ;;  %v4274_v44 = vld [vmem:[%s6203_s3 + $0x1a8] sm:$0xff]  ;;  %1764 = vmatpush.bf16.msrb.mxu1 %v4267_v42  ;;  %v4264_v42 = vld [vmem:[%s6203_s3 + $0x158] sm:$0xff] }
  0x5a   : > { %vm560_vm5 = vcmp.ge.s32.totalorder %v548_v51, 0  ;;  %vm572_vm6 = vcmp.lt.s32.totalorder %v548_v51, 16  ;;  %v4254_v51 = vld [vmem:[%s6203_s3 + $0x108] sm:$0xff] }
  0x5b   : > { %1707 = vmatpush.bf16.msra.mxu0 %v4257_v27  ;;  %1824 = vmatpush.bf16.msrb.mxu2 %v4274_v44  ;;  %v534_v27 = vld [vmem:[%s5031_s19 + $0x8] sm:$0xff]  ;;  %vm584_vm7 = vmand %vm560_vm5, %vm572_vm6  ;;  %v4271_v44 = vld [vmem:[%s6203_s3 + $0x190] sm:$0xff] }
  0x5c   : > { %1619 = vmatmul.bf16.gmra.mxu2 %v4874_v49  ;;  %1883 = vmatpush.bf16.msra.mxu3 %v4282_v43 }
  0x5f   : > { %1550 = vmatmul.bf16.gmra.mxu1 %v4761_v26  ;;  %1708 = vmatpush.bf16.msra.mxu0 %v4256_v56 }
  0x60   : > { %1491 = vmatmul.bf16.gmra.mxu0 %v4878_v33  ;;  %1825 = vmatpush.bf16.msrb.mxu2 %v4273_v62 }
  0x61   : > { %1653 = vmatmul.bf16.vlgmr.msrb.gmra.mxu3 %v4812_v53  ;;  %v4896_v53 = vsel %vm4706_vm13, 0, %v752_v6  ;;  %v787_v6 = vor.u32 %v785_v38, %v784_v55 }
  0x63   : > { %v4970_v7 = vsel %vm4706_vm13, 0, %v787_v6  ;;  %1709 = vmatpush.bf16.msra.mxu0 %v4255_v24 }
  0x67   : > { %1710 = vmatpush.bf16.msra.mxu0 %v4254_v51 }
  0x6c   : > { %1624 = vmatmul.bf16.gmra.mxu2 %v4892_v11 }
  0x6f   : > { %1555 = vmatmul.bf16.gmra.mxu1 %v4832_v10 }
  0x70   : > { %1496 = vmatmul.bf16.gmra.mxu0 %v4896_v53 }
  0x71   : > { %1658 = vmatmul.bf16.gmra.mxu3 %v4855_v19 }
  0x7c   : > { %1629 = vmatmul.bf16.gmra.mxu2 %v4906_v20 }
  0x7f   : > { %1560 = vmatmul.bf16.gmra.mxu1 %v4863_v37 }
  0x80   : > { %1501 = vmatmul.bf16.gmra.mxu0 %v4910_v22 }
  0x81   : > { %1663 = vmatmul.bf16.gmra.mxu3 %v4878_v33 }
  0x8c   : > { %1634 = vmatmul.bf16.gmra.mxu2 %v4920_v35 }
  0x8f   : > { %1565 = vmatmul.bf16.gmra.mxu1 %v4886_v1 }
  0x90   : > { %1506 = vmatmul.bf16.gmra.mxu0 %v4924_v36 }
  0x91   : > { %1668 = vmatmul.bf16.gmra.mxu3 %v4896_v53 }
  0x9c   : > { %1639 = vmatmul.bf16.gmra.mxu2 %v4934_v47 }
  0xa0   : > { %1511 = vmatmul.bf16.gmra.mxu0 %v4938_v48 }
  0xa1   : > { %1673 = vmatmul.bf16.gmra.mxu3 %v4910_v22 }
  0xac   : > { %v1536_v34 = vpop.f32.mrf.mxu1 }
  0xad   : > { %v1477_v59 = vpop.f32.mrf.mxu0 }
  0xae   : > { %v4947_v61 = vadd.f32 %v1536_v34, %v1477_v59  ;;  %v830_v34 = vor.u32 %v829_v39, %v719_v50  ;;  %v4266_v59 = vld [vmem:[%s6203_s3 + $0x168] sm:$0xff]  ;;  %v4281_v50 = vld [vmem:[%s6203_s3 + $0x1e0] sm:$0xff]  ;;  %v631_v39 = vsel %vm584_vm7, %v534_v27, 0.0 }
  0xaf   : > { %1765 = vmatpush.bf16.msrb.mxu1 %v4266_v59  ;;  %1884 = vmatpush.bf16.msra.mxu3 %v4281_v50  ;;  %v655_v62 = vpack.c.bf16 %v631_v39, %v631_v39  ;;  %v831_v50 = vrot.slane %v729_v28, 1  ;;  %v4253_v28 = vld [vmem:[%s6203_s3 + $0x100] sm:$0xff] }
  0xb0   : > { %1516 = vmatmul.bf16.gmra.mxu0 %v4945_v60  ;;  %v868_v6 = vsel %vm4785_vm9, %v830_v34, 0  ;;  %v4279_v34 = vld [vmem:[%s6203_s3 + $0x1d0] sm:$0xff] }
  0xb1   : > { %1678 = vmatmul.bf16.gmra.mxu3 %v4924_v36  ;;  %v832_v24 = vor.u32 %v831_v50, %v726_v15  ;;  %1711 = vmatpush.bf16.msra.mxu0 %v4253_v28 }
  0xb3   : > { %1766 = vmatpush.bf16.msrb.mxu1 %v4265_v13  ;;  %1885 = vmatpush.bf16.msra.mxu3 %v4280_v30  ;;  %v4278_v13 = vld [vmem:[%s6203_s3 + $0x1c8] sm:$0xff] }
  0xb4   : > { %v4954_v63 = vpop.f32.mrf.mxu3  ;;  %v4956_v2 = vpop.f32.mrf.mxu1  ;;  %v4262_v30 = vld [vmem:[%s6203_s3 + $0x148] sm:$0xff] }
  0xb5   : > { %v4958_v4 = vpop.f32.mrf.mxu0 }
  0xb7   : > { %1767 = vmatpush.bf16.msrb.mxu1 %v4264_v42  ;;  %1886 = vmatpush.bf16.msra.mxu3 %v4279_v34  ;;  %v869_v34 = vsel %vm4785_vm9, %v832_v24, 0  ;;  %v833_v24 = vrot.slane %v736_v12, 1 }
  0xbb   : > { %1887 = vmatpush.bf16.msra.mxu3 %v4278_v13 }
  0xbc   : > { %v4963_v8 = vpop.f32.mrf.mxu3  ;;  %v1541_v14 = vpop.f32.mrf.mxu1 }
  0xbd   : > { %v1482_v16 = vpop.f32.mrf.mxu0 }
  0xbe   : > { %v4975_v18 = vadd.f32 %v1541_v14, %v1482_v16  ;;  %v4272_v14 = vld [vmem:[%s6203_s3 + $0x198] sm:$0xff]  ;;  %v533_v16 = vld [vmem:[%s5031_s19] sm:$0xff] }
  0xbf   : > { %v5002_v40 = vpop.f32.mrf.mxu2  ;;  %1826 = vmatpush.bf16.msrb.mxu2 %v4272_v14  ;;  %v630_v23 = vsel %vm584_vm7, %v533_v16, 0.0  ;;  %v703_v16 = vunpack.c.l.b16 %v655_v62 }
  0xc0   : > { %1521 = vmatmul.bf16.gmra.mxu0 %v4970_v7  ;;  %v654_v59 = vpack.c.bf16 %v630_v23, %v630_v23  ;;  %v4269_v23 = vld [vmem:[%s6203_s3 + $0x180] sm:$0xff] }
  0xc1   : > { %1683 = vmatmul.bf16.gmra.mxu3 %v4938_v48 }
  0xc2   : > { %v702_v14 = vunpack.c.l.b16 %v654_v59  ;;  %v4261_v59 = vld [vmem:[%s6203_s3 + $0x140] sm:$0xff] }
  0xc3   : > { %1827 = vmatpush.bf16.msrb.mxu2 %v4271_v44  ;;  %v4277_v44 = vld [vmem:[%s6203_s3 + $0x1c0] sm:$0xff] }
  0xc4   : > { %v4991_v31 = vpop.f32.mrf.mxu3  ;;  %v4993_v32 = vpop.f32.mrf.mxu1  ;;  %v5102_v15 = vpack.c.b16 %v703_v16, %v702_v14  ;;  %1888 = vmatpush.bf16.msra.mxu3 %v4277_v44 }
  0xc5   : > { %v4998_v38 = vpop.f32.mrf.mxu0 }
  0xc7   : > { %v5052_v29 = vpop.f32.mrf.mxu2 }
  0xcc   : > { %v5026_v55 = vpop.f32.mrf.mxu3  ;;  %v1546_v46 = vpop.f32.mrf.mxu1 }
  0xcd   : > { %6227 = vst [vmem:[#allocation3_spill] sm:$0xff] %v5026_v55  ;;  %v1487_v5 = vpop.f32.mrf.mxu0  ;;  %v4290_v55 = vld [vmem:[%s6203_s3 + $0x228] sm:$0xff] }
  0xce   : > { %v5045_v17 = vadd.f32 %v1546_v46, %v1487_v5  ;;  %v4263_v5 = vld [vmem:[%s6203_s3 + $0x150] sm:$0xff] }
  0xcf   : > { %1768 = vmatpush.bf16.msrb.mxu1 %v4263_v5  ;;  %v1615_v27 = vpop.f32.mrf.mxu2  ;;  %v6210_v5 = vshrl.u32 %v5102_v15, 16 }
  0xd0   : > { %1594 = vmatmul.bf16.vlgmr.msrb.gmra.mxu0 %v868_v6  ;;  %v4270_v6 = vld [vmem:[%s6203_s3 + $0x188] sm:$0xff] }
  0xd1   : > { %1688 = vmatmul.bf16.gmra.mxu3 %v4945_v60  ;;  %1828 = vmatpush.bf16.msrb.mxu2 %v4270_v6  ;;  %v4292_v6 = vld [vmem:[%s6203_s3 + $0x238] sm:$0xff] }
  0xd2   : > { %1940 = vmatpush.bf16.msrb.mxu0 %v4292_v6 }
  0xd3   : > { %1769 = vmatpush.bf16.msrb.mxu1 %v4262_v30 }
  0xd4   : > { %v5063_v43 = vpop.f32.mrf.mxu3  ;;  %v5068_v56 = vpop.f32.mrf.mxu1 }
  0xd5   : > { %v5073_v46 = vpop.f32.mrf.mxu0  ;;  %1829 = vmatpush.bf16.msrb.mxu2 %v4269_v23  ;;  %v834_v23 = vor.u32 %v833_v24, %v733_v3  ;;  %v4291_v24 = vld [vmem:[%s6203_s3 + $0x230] sm:$0xff] }
  0xd6   : > { %1941 = vmatpush.bf16.msrb.mxu0 %v4291_v24 }
  0xd7   : > { %1770 = vmatpush.bf16.msrb.mxu1 %v4261_v59  ;;  %v5118_v16 = vpop.f32.mrf.mxu2  ;;  %v5137_v59 = vsel %vm4785_vm9, %v834_v23, 0 }
  0xd8   : > { %1830 = vmatmul.bf16.vlgmr.msrb.gmra.mxu2 %v4855_v19  ;;  %v791_v19 = vrot.slane %v6210_v5, 7  ;;  %6230 = vst [vmem:[#allocation6_spill] sm:$0xff] %v5137_v59 }
  0xda   : > { %1771 = vmatmul.bf16.vlgmr.msrb.gmra.mxu1 %v869_v34  ;;  %1942 = vmatpush.bf16.msrb.mxu0 %v4290_v55 }
  0xdc   : > { %v5097_v39 = vpop.f32.mrf.mxu3  ;;  %v1551_v42 = vpop.f32.mrf.mxu1 }
  0xdd   : > { %6228 = vst [vmem:[#allocation4_spill] sm:$0xff] %v5097_v39  ;;  %v1492_v51 = vpop.f32.mrf.mxu0 }
  0xde   : > { %v1552_v62 = vadd.f32 %v1551_v42, %v1492_v51 }
  0xe0   : > { %v1611_v50 = vadd.f32 %v5002_v40, %v1552_v62  ;;  %1599 = vmatmul.bf16.gmra.mxu0 %v869_v34  ;;  %v6211_v40 = vshll.u32 %v5102_v15, 16  ;;  %v1620_v62 = vpop.f32.mrf.mxu2 }
  0xe1   : > { %1693 = vmatmul.bf16.gmra.mxu3 %v4970_v7 }
  0xe2   : > { %v794_v30 = vor.u32 %v6211_v40, %v791_v19 }
  0xe4   : > { %v5116_v13 = vpop.f32.mrf.mxu3  ;;  %v1553_v14 = vpop.f32.mrf.mxu1  ;;  %v5133_v51 = vsel %vm4706_vm13, 0, %v794_v30 }
  0xe5   : > { %v1494_v28 = vpop.f32.mrf.mxu0 }
  0xe8   : > { %1835 = vmatmul.bf16.gmra.mxu2 %v4878_v33  ;;  %v5148_v23 = vpop.f32.mrf.mxu2 }
  0xea   : > { %1776 = vmatmul.bf16.gmra.mxu1 %v5137_v59 }
  0xec   : > { %v5129_v42 = vpop.f32.mrf.mxu3  ;;  %v1556_v44 = vpop.f32.mrf.mxu1 }
  0xed   : > { %6229 = vst [vmem:[#allocation5_spill] sm:$0xff] %v5129_v42  ;;  %v1497_v34 = vpop.f32.mrf.mxu0 }
  0xee   : > { %v1557_v12 = vadd.f32 %v1556_v44, %v1497_v34 }
  0xf0   : > { %v1616_v6 = vadd.f32 %v1615_v27, %v1557_v12  ;;  %1604 = vmatmul.bf16.gmra.mxu0 %v5137_v59  ;;  %v1625_v5 = vpop.f32.mrf.mxu2 }
  0xf1   : > { %1698 = vmatmul.bf16.gmra.mxu3 %v5133_v51 }
  0xf4   : > { %v5142_v3 = vpop.f32.mrf.mxu3  ;;  %v1558_v19 = vpop.f32.mrf.mxu1 }
  0xf5   : > { %6231 = vst [vmem:[#allocation7_spill] sm:$0xff] %v5142_v3  ;;  %v1499_v30 = vpop.f32.mrf.mxu0 }
  0xf8   : > { %1840 = vmatmul.bf16.gmra.mxu2 %v4896_v53 }
  0xfa   : > { %1781 = vmatmul.bf16.gmra.mxu1 %v4808_v52 }
  0xfc   : > { %v5150_v44 = vpop.f32.mrf.mxu3  ;;  %v1561_v34 = vpop.f32.mrf.mxu1 }
  0xfd   : > { %6232 = vst [vmem:[#allocation8_spill] sm:$0xff] %v5150_v44  ;;  %v1502_v33 = vpop.f32.mrf.mxu0 }
  0xfe   : > { %v1562_v27 = vadd.f32 %v1561_v34, %v1502_v33  ;;  %v5163_v33 = vpop.f32.mrf.mxu2 }
 0x100   : > { %v1621_v12 = vadd.f32 %v1620_v62, %v1562_v27  ;;  %1712 = vmatmul.bf16.vlgmr.msra.gmra.mxu0 %v4724_v0 }
 0x101   : > { %1889 = vmatmul.bf16.vlgmr.msra.gmra.mxu3 %v4814_v54 }
 0x104   : > { %v5155_v40 = vpop.f32.mrf.mxu3  ;;  %v1563_v39 = vpop.f32.mrf.mxu1 }
 0x105   : > { %6233 = vst [vmem:[#allocation9_spill] sm:$0xff] %v5155_v40  ;;  %v1504_v24 = vpop.f32.mrf.mxu0  ;;  %v1554_v40 = vadd.f32 %v1553_v14, %v1494_v28  ;;  %v1559_v28 = vadd.f32 %v1558_v19, %v1499_v30 }
 0x106   : > { %v1630_v55 = vpop.f32.mrf.mxu2 }
 0x107   : > { %v1613_v44 = vadd.f32 %v5052_v29, %v1554_v40 }
 0x108   : > { %1845 = vmatmul.bf16.gmra.mxu2 %v4910_v22  ;;  %v4289_v22 = vld [vmem:[%s6203_s3 + $0x220] sm:$0xff] }
 0x109   : > { %1943 = vmatpush.bf16.msrb.mxu0 %v4289_v22 }
 0x10a   : > { %1786 = vmatmul.bf16.gmra.mxu1 %v4851_v21 }
 0x10c   : > { %v5161_v59 = vpop.f32.mrf.mxu3  ;;  %v1566_v34 = vpop.f32.mrf.mxu1 }
 0x10d   : > { %6234 = vst [vmem:[#allocation10_spill] sm:$0xff] %v5161_v59  ;;  %v1507_v53 = vpop.f32.mrf.mxu0 }
 0x10e   : > { %v1567_v62 = vadd.f32 %v1566_v34, %v1507_v53 }
 0x110   : > { %v1626_v0 = vadd.f32 %v1625_v5, %v1567_v62  ;;  %1717 = vmatmul.bf16.gmra.mxu0 %v4814_v54 }
 0x111   : > { %1894 = vmatmul.bf16.gmra.mxu3 %v4761_v26 }
 0x114   : > { %v1669_v27 = vpop.f32.mrf.mxu3 }
 0x115   : > { %v5168_v52 = vadd.f32 %v1669_v27, %v1611_v50  ;;  %v1509_v59 = vpop.f32.mrf.mxu0  ;;  %v1632_v50 = vpop.f32.mrf.mxu2 }
 0x118   : > { %1850 = vmatmul.bf16.gmra.mxu2 %v4924_v36  ;;  %v4288_v36 = vld [vmem:[%s6203_s3 + $0x218] sm:$0xff] }
 0x119   : > { %1944 = vmatpush.bf16.msrb.mxu0 %v4288_v36 }
 0x11a   : > { %1791 = vmatmul.bf16.gmra.mxu1 %v4874_v49 }
 0x11c   : > { %v1671_v3 = vpop.f32.mrf.mxu3 }
 0x11d   : > { %v5172_v42 = vadd.f32 %v1671_v3, %v1613_v44  ;;  %v1512_v5 = vpop.f32.mrf.mxu0  ;;  %v1618_v44 = vadd.f32 %v5118_v16, %v1559_v28  ;;  %v1635_v34 = vpop.f32.mrf.mxu2 }
 0x11e   : > { %v1572_v54 = vadd.f32 %v4954_v63, %v1512_v5 }
 0x120   : > { %v1631_v14 = vadd.f32 %v1630_v55, %v1572_v54  ;;  %1722 = vmatmul.bf16.gmra.mxu0 %v4761_v26 }
 0x121   : > { %1899 = vmatmul.bf16.gmra.mxu3 %v4832_v10 }
 0x124   : > { %v1674_v29 = vpop.f32.mrf.mxu3 }
 0x125   : > { %v5181_v40 = vadd.f32 %v1674_v29, %v1616_v6  ;;  %v1514_v3 = vpop.f32.mrf.mxu0  ;;  %v5198_v19 = vpop.f32.mrf.mxu2 }
 0x128   : > { %1855 = vmatmul.bf16.gmra.mxu2 %v4938_v48 }
 0x12a   : > { %1796 = vmatmul.bf16.gmra.mxu1 %v4892_v11 }
 0x12c   : > { %v1676_v53 = vpop.f32.mrf.mxu3 }
 0x12d   : > { %v5185_v63 = vadd.f32 %v1676_v53, %v1618_v44  ;;  %v1517_v62 = vpop.f32.mrf.mxu0  ;;  %v1640_v5 = vpop.f32.mrf.mxu2 }
 0x12e   : > { %v1577_v27 = vadd.f32 %v4991_v31, %v1517_v62  ;;  %v1564_v31 = vadd.f32 %v1563_v39, %v1504_v24  ;;  %v1568_v39 = vpop.f32.mrf.mxu1  ;;  %v1574_v62 = vadd.f32 %v4963_v8, %v1514_v3  ;;  %v536_v8 = vld [vmem:[%s5031_s19 + $0x18] sm:$0xff] }
 0x12f   : > { %v1569_v28 = vadd.f32 %v1568_v39, %v1509_v59 }
 0x130   : > { %v5190_v26 = vadd.f32 %v1635_v34, %v1577_v27  ;;  %1727 = vmatmul.bf16.gmra.mxu0 %v4832_v10  ;;  %v1623_v48 = vadd.f32 %v5148_v23, %v1564_v31  ;;  %v4287_v23 = vld [vmem:[%s6203_s3 + $0x210] sm:$0xff] }
 0x131   : > { %1904 = vmatmul.bf16.gmra.mxu3 %v4863_v37  ;;  %1945 = vmatpush.bf16.msrb.mxu0 %v4287_v23 }
 0x134   : > { %v1679_v16 = vpop.f32.mrf.mxu3 }
 0x135   : > { %v5196_v6 = vadd.f32 %v1679_v16, %v1621_v12  ;;  %v5201_v30 = vpop.f32.mrf.mxu0  ;;  %v549_v16 = vadd.s32 11, %v4613_v9 }
 0x137   : > { %vm561_vm8 = vcmp.ge.s32.totalorder %v549_v16, 0  ;;  %vm573_vm10 = vcmp.lt.s32.totalorder %v549_v16, 16 }
 0x138   : > { %1860 = vmatmul.bf16.gmra.mxu2 %v4945_v60  ;;  %v1628_v60 = vadd.f32 %v5163_v33, %v1569_v28  ;;  %v1539_v33 = vadd.f32 %v4956_v2, %v4958_v4  ;;  %v535_v4 = vld [vmem:[%s5031_s19 + $0x10] sm:$0xff]  ;;  %vm585_vm11 = vmand %vm561_vm8, %vm573_vm10 }
 0x139   : > { %v633_v3 = vsel %vm585_vm11, %v536_v8, 0.0 }
 0x13a   : > { %1801 = vmatmul.bf16.gmra.mxu1 %v4906_v20 }
 0x13c   : > { %v1681_v55 = vpop.f32.mrf.mxu3 }
 0x13d   : > { %v5204_v22 = vadd.f32 %v1681_v55, %v1623_v48  ;;  %v1522_v10 = vpop.f32.mrf.mxu0  ;;  %v657_v55 = vpack.c.bf16 %v633_v3, %v633_v3 }
 0x13e   : > { %v1582_v54 = vadd.f32 %v5063_v43, %v1522_v10 }
 0x140   : > { %v5209_v12 = vadd.f32 %v1640_v5, %v1582_v54  ;;  %1732 = vmatmul.bf16.gmra.mxu0 %v4863_v37  ;;  %v705_v5 = vunpack.c.l.b16 %v657_v55  ;;  %v6238_v55 = vld [vmem:[#allocation7_spill] sm:$0xff] }
 0x141   : > { %1909 = vmatmul.bf16.gmra.mxu3 %v4886_v1 }
 0x144   : > { %v1684_v24 = vpop.f32.mrf.mxu3 }
 0x145   : > { %v5212_v29 = vadd.f32 %v1684_v24, %v1626_v0  ;;  %v5218_v43 = vpop.f32.mrf.mxu0 }
 0x148   : > { %1865 = vmatmul.bf16.gmra.mxu2 %v4970_v7  ;;  %v4286_v7 = vld [vmem:[%s6203_s3 + $0x208] sm:$0xff] }
 0x149   : > { %1946 = vmatpush.bf16.msrb.mxu0 %v4286_v7 }
 0x14a   : > { %1806 = vmatmul.bf16.gmra.mxu1 %v4920_v35 }
 0x14c   : > { %v1686_v44 = vpop.f32.mrf.mxu3 }
 0x14d   : > { %v5221_v34 = vadd.f32 %v1686_v44, %v1628_v60  ;;  %v1595_v37 = vpop.f32.mrf.mxu0 }
 0x14e   : > { %v5224_v53 = vadd.f32 %v1595_v37, %v4947_v61  ;;  %v6235_v37 = vshll.u32 %v5102_v15, 16 }
 0x150   : > { %1737 = vmatmul.bf16.gmra.mxu0 %v4886_v1  ;;  %v1633_v1 = vadd.f32 %v1632_v50, %v1574_v62  ;;  %v632_v50 = vsel %vm585_vm11, %v535_v4, 0.0  ;;  %v6236_v62 = vshrl.u32 %v5102_v15, 16  ;;  %v4308_v4 = vld [vmem:[%s6204_s4 + $0x78] sm:$0xff] }
 0x151   : > { %1914 = vmatmul.bf16.gmra.mxu3 %v4710_v58  ;;  %v656_v48 = vpack.c.bf16 %v632_v50, %v632_v50  ;;  %2983 = vmatpush.bf16.msra.mxu2 %v4308_v4  ;;  %v4297_v4 = vld [vmem:[%s6204_s4 + $0x20] sm:$0xff] }
 0x154   : > { %v1689_v0 = vpop.f32.mrf.mxu3 }
 0x155   : > { %v5229_v59 = vadd.f32 %v1689_v0, %v1631_v14  ;;  %v1597_v61 = vpop.f32.mrf.mxu0  ;;  %v849_v0 = vrot.slane %v6235_v37, 1 }
 0x156   : > { %v1598_v27 = vadd.f32 %v1597_v61, %v1539_v33 }
 0x157   : > { %v850_v61 = vor.u32 %v849_v0, %v6236_v62 }
 0x158   : > { %1870 = vmatmul.bf16.gmra.mxu2 %v5133_v51  ;;  %v1544_v51 = vadd.f32 %v4993_v32, %v4998_v38  ;;  %v4285_v32 = vld [vmem:[%s6203_s3 + $0x200] sm:$0xff] }
 0x159   : > { %1947 = vmatpush.bf16.msrb.mxu0 %v4285_v32  ;;  %v5277_v7 = vsel %vm4785_vm9, %v850_v61, 0 }
 0x15a   : > { %1811 = vmatmul.bf16.gmra.mxu1 %v4934_v47 }
 0x15c   : > { %v1691_v36 = vpop.f32.mrf.mxu3 }
 0x15d   : > { %v5238_v14 = vadd.f32 %v1691_v36, %v1633_v1  ;;  %v1600_v31 = vpop.f32.mrf.mxu0 }
 0x15e   : > { %v1601_v2 = vadd.f32 %v1600_v31, %v4975_v18  ;;  %v704_v18 = vunpack.c.l.b16 %v656_v48 }
 0x160   : > { %1742 = vmatmul.bf16.gmra.mxu0 %v4710_v58  ;;  %v5253_v39 = vpack.c.b16 %v705_v5, %v704_v18 }
 0x161   : > { %1919 = vmatmul.bf16.gmra.mxu3 %v4794_v45 }
 0x162   : > { %v796_v58 = vshrl.u32 %v5253_v39, 16  ;;  %v799_v28 = vshll.u32 %v5253_v39, 16 }
 0x164   : > { %v1694_v10 = vpop.f32.mrf.mxu3  ;;  %v798_v23 = vrot.slane %v796_v58, 7 }
 0x165   : > { %v5248_v9 = vadd.f32 %v1694_v10, %v5190_v26  ;;  %v1602_v54 = vpop.f32.mrf.mxu0  ;;  %v1660_v10 = vadd.f32 %v6238_v55, %v1601_v2 }
 0x166   : > { %v1603_v24 = vadd.f32 %v1602_v54, %v1544_v51  ;;  %v801_v60 = vor.u32 %v799_v28, %v798_v23  ;;  %v6240_v54 = vld [vmem:[#allocation9_spill] sm:$0xff] }
 0x168   : > { %v828_v44 = vsel %vm4706_vm13, 0, %v801_v60 }
 0x169   : > { %1875 = vmatmul.bf16.gmra.mxu2 %v828_v44  ;;  %v6242_v44 = vld [vmem:[#allocation10_spill] sm:$0xff] }
 0x16a   : > { %1816 = vmatmul.bf16.gmra.mxu1 %v5277_v7 }
 0x16c   : > { %v5259_v26 = vpop.f32.mrf.mxu3 }
 0x16d   : > { %v1605_v38 = vpop.f32.mrf.mxu0 }
 0x16e   : > { %v1606_v33 = vadd.f32 %v1605_v38, %v5045_v17  ;;  %v1549_v17 = vadd.f32 %v5068_v56, %v5073_v46  ;;  %v6237_v56 = vld [vmem:[#allocation5_spill] sm:$0xff]  ;;  %v6241_v38 = vld [vmem:[#allocation6_spill] sm:$0xff] }
 0x16f   : > { %v1657_v46 = vadd.f32 %v6237_v56, %v1598_v27  ;;  %v6239_v27 = vld [vmem:[#allocation8_spill] sm:$0xff]  ;;  %v4296_v56 = vld [vmem:[%s6204_s4 + $0x18] sm:$0xff] }
 0x170   : > { %1747 = vmatmul.bf16.gmra.mxu0 %v4794_v45  ;;  %v1655_v45 = vadd.f32 %v5116_v13, %v5224_v53  ;;  %v4307_v13 = vld [vmem:[%s6204_s4 + $0x70] sm:$0xff]  ;;  %v1662_v5 = vadd.f32 %v6239_v27, %v1603_v24  ;;  %v1665_v23 = vadd.f32 %v6240_v54, %v1606_v33  ;;  %v4298_v24 = vld [vmem:[%s6204_s4 + $0x28] sm:$0xff] }
 0x171   : > { %1924 = vmatmul.bf16.gmra.mxu3 %v4847_v25  ;;  %2984 = vmatpush.bf16.msra.mxu2 %v4307_v13  ;;  %v5373_v13 = vpop.f32.mrf.mxu2  ;;  %v4294_v54 = vld [vmem:[%s6204_s4 + $0x8] sm:$0xff] }
 0x174   : > { %v1699_v1 = vpop.f32.mrf.mxu3 }
 0x175   : > { %v5280_v36 = vadd.f32 %v1699_v1, %v5209_v12  ;;  %v1607_v16 = vpop.f32.mrf.mxu0  ;;  %v4300_v12 = vld [vmem:[%s6204_s4 + $0x38] sm:$0xff]  ;;  %v6243_v1 = vld [vmem:[#allocation2_spill] sm:$0xff] }
 0x176   : > { %v1608_v31 = vadd.f32 %v1607_v16, %v1549_v17  ;;  %2934 = vmatpush.bf16.msra.mxu1 %v4300_v12  ;;  %v4305_v17 = vld [vmem:[%s6204_s4 + $0x60] sm:$0xff] }
 0x178   : > { %v1667_v37 = vadd.f32 %v6242_v44, %v1608_v31 }
 0x17d   : > { %v1713_v8 = vpop.f32.mrf.mxu0 }
 0x17e   : > { %v5293_v50 = vadd.f32 %v1713_v8, %v1655_v45 }
 0x180   : > { %1752 = vmatmul.bf16.gmra.mxu0 %v4847_v25  ;;  %v4299_v25 = vld [vmem:[%s6204_s4 + $0x30] sm:$0xff] }
 0x181   : > { %1929 = vmatmul.bf16.gmra.mxu3 %v5102_v15  ;;  %2935 = vmatpush.bf16.msra.mxu1 %v4299_v25  ;;  %v1772_v25 = vpop.f32.mrf.mxu1 }
 0x185   : > { %v1715_v3 = vpop.f32.mrf.mxu0  ;;  %2936 = vmatpush.bf16.msra.mxu1 %v4298_v24  ;;  %v4315_v24 = vld [vmem:[%s6204_s4 + $0xb0] sm:$0xff] }
 0x186   : > { %v5298_v48 = vadd.f32 %v1715_v3, %v1657_v46 }
 0x189   : > { %2937 = vmatpush.bf16.msra.mxu1 %v4297_v4 }
 0x18d   : > { %v1718_v53 = vpop.f32.mrf.mxu0  ;;  %2938 = vmatpush.bf16.msra.mxu1 %v4296_v56 }
 0x18e   : > { %v5304_v18 = vadd.f32 %v1718_v53, %v1660_v10  ;;  %v5375_v53 = vpop.f32.mrf.mxu3 }
 0x190   : > { %1757 = vmatmul.bf16.gmra.mxu0 %v5102_v15  ;;  %v4306_v15 = vld [vmem:[%s6204_s4 + $0x68] sm:$0xff] }
 0x191   : > { %1934 = vmatmul.bf16.gmra.mxu3 %v5253_v39  ;;  %2985 = vmatpush.bf16.msra.mxu2 %v4306_v15 }
 0x195   : > { %v1720_v2 = vpop.f32.mrf.mxu0  ;;  %2986 = vmatpush.bf16.msra.mxu2 %v4305_v17 }
 0x196   : > { %v5312_v51 = vadd.f32 %v1720_v2, %v1662_v5  ;;  %v1831_v5 = vpop.f32.mrf.mxu2  ;;  %v1890_v2 = vpop.f32.mrf.mxu3 }
 0x19d   : > { %v1723_v60 = vpop.f32.mrf.mxu0 }
 0x19e   : > { %v5315_v32 = vadd.f32 %v1723_v60, %v1665_v23 }
 0x1a0   : > { %1948 = vmatmul.bf16.vlgmr.msrb.gmra.mxu0 %v6241_v38  ;;  %v1892_v38 = vpop.f32.mrf.mxu3 }
 0x1a5   : > { %v1725_v0 = vpop.f32.mrf.mxu0 }
 0x1a6   : > { %v5325_v62 = vadd.f32 %v1725_v0, %v1667_v37 }
 0x1ad   : > { %v1728_v33 = vpop.f32.mrf.mxu0 }
 0x1ae   : > { %v5328_v61 = vadd.f32 %v1728_v33, %v5168_v52 }
 0x1b0   : > { %1953 = vmatmul.bf16.gmra.mxu0 %v6243_v1  ;;  %v5407_v1 = vpop.f32.mrf.mxu3 }
 0x1b5   : > { %v1730_v16 = vpop.f32.mrf.mxu0 }
 0x1b6   : > { %v5335_v31 = vadd.f32 %v1730_v16, %v5172_v42  ;;  %v4304_v42 = vld [vmem:[%s6204_s4 + $0x58] sm:$0xff] }
 0x1b7   : > { %2987 = vmatpush.bf16.msra.mxu2 %v4304_v42  ;;  %v4312_v16 = vld [vmem:[%s6204_s4 + $0x98] sm:$0xff]  ;;  %v4311_v42 = vld [vmem:[%s6204_s4 + $0x90] sm:$0xff] }
 0x1b8   : > { %v5429_v56 = vpop.f32.mrf.mxu3 }
 0x1bd   : > { %v1733_v45 = vpop.f32.mrf.mxu0 }
 0x1be   : > { %v5341_v52 = vadd.f32 %v1733_v45, %v5181_v40 }
 0x1c0   : > { %1958 = vmatmul.bf16.gmra.mxu0 %v4851_v21 }
 0x1c5   : > { %v1735_v12 = vpop.f32.mrf.mxu0 }
 0x1c6   : > { %v5345_v8 = vadd.f32 %v1735_v12, %v5185_v63  ;;  %v4303_v63 = vld [vmem:[%s6204_s4 + $0x50] sm:$0xff] }
 0x1c7   : > { %2988 = vmatpush.bf16.msra.mxu2 %v4303_v63  ;;  %v1773_v63 = vadd.f32 %v1772_v25, %v5293_v50 }
 0x1cd   : > { %v1738_v46 = vpop.f32.mrf.mxu0 }
 0x1ce   : > { %v5354_v3 = vadd.f32 %v1738_v46, %v5196_v6  ;;  %v4295_v6 = vld [vmem:[%s6204_s4 + $0x10] sm:$0xff] }
 0x1cf   : > { %2939 = vmatpush.bf16.msra.mxu1 %v4295_v6  ;;  %v4309_v6 = vld [vmem:[%s6204_s4 + $0x80] sm:$0xff] }
 0x1d0   : > { %1963 = vmatmul.bf16.gmra.mxu0 %v4874_v49 }
 0x1d3   : > { %2940 = vmatpush.bf16.msra.mxu1 %v4294_v54 }
 0x1d5   : > { %v1740_v21 = vpop.f32.mrf.mxu0 }
 0x1d6   : > { %v5358_v40 = vadd.f32 %v1740_v21, %v5204_v22  ;;  %v4293_v21 = vld [vmem:[%s6204_s4] sm:$0xff] }
 0x1d7   : > { %2941 = vmatpush.bf16.msra.mxu1 %v4293_v21 }
 0x1dd   : > { %v1743_v55 = vpop.f32.mrf.mxu0 }
 0x1de   : > { %v5364_v10 = vadd.f32 %v1743_v55, %v5212_v29 }
 0x1e0   : > { %1968 = vmatmul.bf16.gmra.mxu0 %v4892_v11  ;;  %v4302_v11 = vld [vmem:[%s6204_s4 + $0x48] sm:$0xff] }
 0x1e1   : > { %2989 = vmatpush.bf16.msra.mxu2 %v4302_v11  ;;  %v4348_v11 = vld [vmem:[%s6204_s4 + $0x1b8] sm:$0xff] }
 0x1e2   : > { %3228 = vmatpush.bf16.msra.mxu0 %v4348_v11  ;;  %v4331_v11 = vld [vmem:[%s6204_s4 + $0x130] sm:$0xff] }
 0x1e5   : > { %v1745_v49 = vpop.f32.mrf.mxu0 }
 0x1e6   : > { %v5371_v22 = vadd.f32 %v1745_v49, %v5221_v34  ;;  %v4316_v34 = vld [vmem:[%s6204_s4 + $0xb8] sm:$0xff]  ;;  %v1832_v49 = vadd.f32 %v1831_v5, %v1773_v63 }
 0x1e7   : > { %3032 = vmatpush.bf16.msrb.mxu3 %v4316_v34  ;;  %v5456_v34 = vld [vmem:[%s6205_s5] ss:$0 sm:$0xff] }
 0x1e8   : > { %v1891_v50 = vadd.f32 %v1890_v2, %v1832_v49 }
 0x1eb   : > { %3033 = vmatpush.bf16.msrb.mxu3 %v4315_v24  ;;  %v5471_v24 = vstv %s3924_s16 }
 0x1ec   : > { %vm2078_vm12 = vcmp.ge.s32.totalorder %v5471_v24, 0  ;;  %vm2088_vm14 = vcmp.lt.s32.totalorder %v5471_v24, 16 }
 0x1ed   : > { %v1748_v27 = vpop.f32.mrf.mxu0  ;;  %vm5494_vm15 = vmand %vm2078_vm12, %vm2088_vm14 }
 0x1ee   : > { %v5378_v29 = vadd.f32 %v1748_v27, %v5229_v59  ;;  %v1774_v59 = vpop.f32.mrf.mxu1  ;;  %v5447_v27 = vpop.f32.mrf.mxu3 }
 0x1ef   : > { %v1775_v25 = vadd.f32 %v1774_v59, %v5298_v48  ;;  %v4347_v48 = vld [vmem:[%s6204_s4 + $0x1b0] sm:$0xff] }
 0x1f0   : > { %1973 = vmatmul.bf16.gmra.mxu0 %v4906_v20  ;;  %v1833_v20 = vpop.f32.mrf.mxu2 }
 0x1f1   : > { %v1834_v2 = vadd.f32 %v1833_v20, %v1775_v25  ;;  %3229 = vmatpush.bf16.msra.mxu0 %v4347_v48 }
 0x1f3   : > { %v1893_v20 = vadd.f32 %v1892_v38, %v1834_v2 }
 0x1f5   : > { %v1750_v23 = vpop.f32.mrf.mxu0 }
 0x1f6   : > { %v5391_v60 = vadd.f32 %v1750_v23, %v5238_v14  ;;  %v1777_v37 = vpop.f32.mrf.mxu1  ;;  %v4314_v14 = vld [vmem:[%s6204_s4 + $0xa8] sm:$0xff] }
 0x1f7   : > { %3034 = vmatpush.bf16.msrb.mxu3 %v4314_v14 }
 0x1f8   : > { %v5400_v0 = vpop.f32.mrf.mxu2 }
 0x1fd   : > { %v1753_v15 = vpop.f32.mrf.mxu0 }
 0x1fe   : > { %v5394_v44 = vadd.f32 %v1753_v15, %v5248_v9  ;;  %v4313_v9 = vld [vmem:[%s6204_s4 + $0xa0] sm:$0xff]  ;;  %v5412_v17 = vpop.f32.mrf.mxu1 }
 0x1ff   : > { %3035 = vmatpush.bf16.msrb.mxu3 %v4313_v9  ;;  %v5464_v15 = vld [vmem:[%s6206_s6] ss:$0 sm:$0xff]  ;;  %v4332_v9 = vld [vmem:[%s6204_s4 + $0x138] sm:$0xff] }
 0x200   : > { %1978 = vmatmul.bf16.gmra.mxu0 %v4920_v35  ;;  %v4301_v35 = vld [vmem:[%s6204_s4 + $0x40] sm:$0xff]  ;;  %v5420_v4 = vpop.f32.mrf.mxu2 }
 0x201   : > { %2990 = vmatpush.bf16.msra.mxu2 %v4301_v35  ;;  %v4324_v35 = vld [vmem:[%s6204_s4 + $0xf8] sm:$0xff] }
 0x202   : > { %3081 = vmatpush.bf16.msrb.mxu1 %v4324_v35 }
 0x203   : > { %3036 = vmatpush.bf16.msrb.mxu3 %v4312_v16 }
 0x205   : > { %v5405_v33 = vpop.f32.mrf.mxu0  ;;  %3130 = vmatpush.bf16.msrb.mxu2 %v4332_v9 }
 0x206   : > { %v5431_v46 = vpop.f32.mrf.mxu1 }
 0x207   : > { %3037 = vmatpush.bf16.msrb.mxu3 %v4311_v42  ;;  %v5488_v42 = vpop.f32.mrf.mxu3 }
 0x209   : > { %3131 = vmatpush.bf16.msrb.mxu2 %v4331_v11 }
 0x20d   : > { %v1758_v45 = vpop.f32.mrf.mxu0 }
 0x20e   : > { %v5423_v12 = vadd.f32 %v1758_v45, %v5280_v36  ;;  %v4310_v36 = vld [vmem:[%s6204_s4 + $0x88] sm:$0xff]  ;;  %v5458_v54 = vpop.f32.mrf.mxu1  ;;  %v1778_v45 = vadd.f32 %v1777_v37, %v5304_v18  ;;  %v4345_v18 = vld [vmem:[%s6204_s4 + $0x1a0] sm:$0xff] }
 0x20f   : > { %3038 = vmatpush.bf16.msrb.mxu3 %v4310_v36  ;;  %v851_v36 = vrot.slane %v799_v28, 1 }
 0x210   : > { %1983 = vmatmul.bf16.gmra.mxu0 %v4934_v47  ;;  %v5442_v47 = vpop.f32.mrf.mxu2  ;;  %v1837_v38 = vadd.f32 %v5400_v0, %v1778_v45  ;;  %v1780_v0 = vadd.f32 %v5412_v17, %v5312_v51 }
 0x211   : > { %v852_v28 = vor.u32 %v851_v36, %v796_v58 }
 0x212   : > { %v1896_v48 = vadd.f32 %v5407_v1, %v1837_v38  ;;  %v4343_v1 = vld [vmem:[%s6204_s4 + $0x190] sm:$0xff]  ;;  %v1839_v51 = vadd.f32 %v5420_v4, %v1780_v0 }
 0x213   : > { %3039 = vmatpush.bf16.msrb.mxu3 %v4309_v6  ;;  %v4323_v4 = vld [vmem:[%s6204_s4 + $0xf0] sm:$0xff] }
 0x214   : > { %v1898_v38 = vadd.f32 %v5429_v56, %v1839_v51  ;;  %3082 = vmatpush.bf16.msrb.mxu1 %v4323_v4 }
 0x215   : > { %v5440_v55 = vpop.f32.mrf.mxu0 }
 0x216   : > { %v5492_v49 = vpop.f32.mrf.mxu1 }
 0x218   : > { %v5473_v14 = vpop.f32.mrf.mxu2 }
 0x21d   : > { %v1949_v23 = vpop.f32.mrf.mxu0 }
 0x21e   : > { %v1950_v5 = vadd.f32 %v1949_v23, %v1891_v50  ;;  %v5528_v45 = vpop.f32.mrf.mxu1 }
 0x220   : > { %v2003_v59 = vmul.f32 %v5456_v34, %v1950_v5  ;;  %1988 = vmatmul.bf16.gmra.mxu0 %v5277_v7  ;;  %v4346_v7 = vld [vmem:[%s6204_s4 + $0x1a8] sm:$0xff]  ;;  %v5508_v23 = vpop.f32.mrf.mxu2  ;;  %v4344_v5 = vld [vmem:[%s6204_s4 + $0x198] sm:$0xff] }
 0x221   : > { %3230 = vmatpush.bf16.msra.mxu0 %v4346_v7 }
 0x222   : > { %v2027_v16 = vadd.f32 %v5464_v15, %v2003_v59  ;;  %v879_v59 = vsel %vm4785_vm9, %v852_v28, 0 }
 0x224   : > { %v2047_v63 = vmax.f32 %v2027_v16, 0.0  ;;  %v5520_v16 = vpop.f32.mrf.mxu3 }
 0x225   : > { %v1951_v21 = vpop.f32.mrf.mxu0  ;;  %3231 = vmatpush.bf16.msra.mxu0 %v4345_v18  ;;  %v4342_v18 = vld [vmem:[%s6204_s4 + $0x188] sm:$0xff] }
 0x226   : > { %v1952_v6 = vadd.f32 %v1951_v21, %v1893_v20  ;;  %v2128_v50 = vsel %vm5494_vm15, %v2047_v63, 0.0  ;;  %v2069_v20 = vadd.s32 1, %v5471_v24  ;;  %v5559_v51 = vpop.f32.mrf.mxu1 }
 0x227   : > { %v2148_v39 = vpack.c.bf16 %v2128_v50, %v2128_v50 }
 0x228   : > { %v2004_v37 = vmul.f32 %v5456_v34, %v1952_v6  ;;  %vm2079_vm0 = vcmp.ge.s32.totalorder %v2069_v20, 0  ;;  %vm2089_vm1 = vcmp.lt.s32.totalorder %v2069_v20, 16  ;;  %v5543_v28 = vpop.f32.mrf.mxu2 }
 0x229   : > { %3232 = vmatpush.bf16.msra.mxu0 %v4344_v5  ;;  %v2188_v21 = vunpack.c.l.b16 %v2148_v39  ;;  %vm5545_vm2 = vmand %vm2079_vm0, %vm2089_vm1 }
 0x22a   : > { %v2028_v25 = vadd.f32 %v5464_v15, %v2004_v37  ;;  %v1783_v37 = vadd.f32 %v5431_v46, %v5315_v32  ;;  %v4341_v32 = vld [vmem:[%s6204_s4 + $0x180] sm:$0xff] }
 0x22c   : > { %v2048_v2 = vmax.f32 %v2028_v25, 0.0  ;;  %v1842_v46 = vadd.f32 %v5442_v47, %v1783_v37 }
 0x22d   : > { %v1954_v58 = vpop.f32.mrf.mxu0  ;;  %3233 = vmatpush.bf16.msra.mxu0 %v4343_v1 }
 0x22e   : > { %v2129_v9 = vsel %vm5494_vm15, %v2048_v2, 0.0  ;;  %v1955_v35 = vadd.f32 %v1954_v58, %v1896_v48  ;;  %v1901_v20 = vadd.f32 %v5447_v27, %v1842_v46  ;;  %v2070_v27 = vadd.s32 2, %v5471_v24 }
 0x22f   : > { %v2149_v7 = vpack.c.bf16 %v2129_v9, %v2129_v9 }
 0x230   : > { %v2005_v17 = vmul.f32 %v5456_v34, %v1955_v35  ;;  %1993 = vmatmul.bf16.gmra.mxu0 %v879_v59  ;;  %v5554_v59 = vpop.f32.mrf.mxu3  ;;  %vm2080_vm3 = vcmp.ge.s32.totalorder %v2070_v27, 0  ;;  %vm2090_vm4 = vcmp.lt.s32.totalorder %v2070_v27, 16 }
 0x231   : > { %v2189_v36 = vunpack.c.l.b16 %v2149_v7  ;;  %3234 = vmatpush.bf16.msra.mxu0 %v4342_v18  ;;  %v5570_v18 = vpop.f32.mrf.mxu2  ;;  %vm5594_vm5 = vmand %vm2080_vm3, %vm2090_vm4 }
 0x232   : > { %v2029_v63 = vadd.f32 %v5464_v15, %v2005_v17 }
 0x233   : > { %v2208_v6 = vpack.c.b16 %v2189_v36, %v2188_v21  ;;  %v1785_v21 = vadd.f32 %v5458_v54, %v5325_v62 }
 0x234   : > { %v2049_v48 = vmax.f32 %v2029_v63, 0.0 }
 0x235   : > { %v1956_v50 = vpop.f32.mrf.mxu0  ;;  %2991 = vmatmul.bf16.vlgmr.msra.gmra.mxu2 %v2208_v6  ;;  %v2219_v25 = vshrl.u32 %v2208_v6, 16  ;;  %v2222_v5 = vshll.u32 %v2208_v6, 16  ;;  %3235 = vmatpush.bf16.msra.mxu0 %v4341_v32  ;;  %v1844_v37 = vadd.f32 %v5473_v14, %v1785_v21  ;;  %v4322_v14 = vld [vmem:[%s6204_s4 + $0xe8] sm:$0xff] }
 0x236   : > { %v1957_v0 = vadd.f32 %v1956_v50, %v1898_v38  ;;  %v2130_v7 = vsel %vm5545_vm2, %v2049_v48, 0.0  ;;  %3083 = vmatpush.bf16.msrb.mxu1 %v4322_v14 }
 0x237   : > { %v2221_v56 = vrot.slane %v2219_v25, 7  ;;  %v2308_v39 = vrot.slane %v2222_v5, 1  ;;  %v2150_v63 = vpack.c.bf16 %v2130_v7, %v2130_v7  ;;  %v1903_v2 = vadd.f32 %v5488_v42, %v1844_v37 }
 0x238   : > { %v2006_v58 = vmul.f32 %v5456_v34, %v1957_v0  ;;  %v4330_v0 = vld [vmem:[%s6204_s4 + $0x128] sm:$0xff] }
 0x239   : > { %v2224_v9 = vor.u32 %v2222_v5, %v2221_v56  ;;  %v2309_v35 = vor.u32 %v2308_v39, %v2219_v25  ;;  %v2190_v25 = vunpack.c.l.b16 %v2150_v63  ;;  %v5576_v5 = vpop.f32.mrf.mxu3  ;;  %v1788_v56 = vadd.f32 %v5492_v49, %v5328_v61  ;;  %v5589_v39 = vpop.f32.mrf.mxu1  ;;  %3132 = vmatpush.bf16.msrb.mxu2 %v4330_v0 }
 0x23a   : > { %v2030_v1 = vadd.f32 %v5464_v15, %v2006_v58 }
 0x23b   : > { %v2298_v17 = vsel %vm4706_vm13, 0, %v2224_v9  ;;  %v2338_v47 = vsel %vm4785_vm9, %v2309_v35, 0  ;;  %v1847_v7 = vadd.f32 %v5508_v23, %v1788_v56 }
 0x23c   : > { %v2050_v36 = vmax.f32 %v2030_v1, 0.0  ;;  %2942 = vmatmul.bf16.vlgmr.msra.gmra.mxu1 %v2298_v17  ;;  %3040 = vmatmul.bf16.vlgmr.msrb.gmra.mxu3 %v2338_v47  ;;  %v5600_v17 = vpop.f32.mrf.mxu2 }
 0x23d   : > { %v1959_v6 = vpop.f32.mrf.mxu0  ;;  %v1906_v23 = vadd.f32 %v5520_v16, %v1847_v7 }
 0x23e   : > { %v2131_v11 = vsel %vm5545_vm2, %v2050_v36, 0.0  ;;  %v1960_v4 = vadd.f32 %v1959_v6, %v1901_v20 }
 0x23f   : > { %v2151_v38 = vpack.c.bf16 %v2131_v11, %v2131_v11  ;;  %v1790_v11 = vadd.f32 %v5528_v45, %v5335_v31  ;;  %v2071_v31 = vadd.s32 3, %v5471_v24 }
 0x240   : > { %v2007_v50 = vmul.f32 %v5456_v34, %v1960_v4 }
 0x241   : > { %v2191_v62 = vunpack.c.l.b16 %v2151_v38  ;;  %v5618_v38 = vpop.f32.mrf.mxu3  ;;  %v1849_v16 = vadd.f32 %v5543_v28, %v1790_v11  ;;  %v4321_v28 = vld [vmem:[%s6204_s4 + $0xe0] sm:$0xff]  ;;  %vm2081_vm6 = vcmp.ge.s32.totalorder %v2071_v31, 0  ;;  %vm2091_vm7 = vcmp.lt.s32.totalorder %v2071_v31, 16 }
 0x242   : > { %v2031_v54 = vadd.f32 %v5464_v15, %v2007_v50  ;;  %3084 = vmatpush.bf16.msrb.mxu1 %v4321_v28  ;;  %vm5642_vm8 = vmand %vm2081_vm6, %vm2091_vm7 }
 0x243   : > { %v5578_v48 = vpack.c.b16 %v2191_v62, %v2190_v25  ;;  %v1797_v62 = vpop.f32.mrf.mxu1 }
 0x244   : > { %v2051_v9 = vmax.f32 %v2031_v54, 0.0  ;;  %v5626_v56 = vpop.f32.mrf.mxu2 }
 0x245   : > { %v1961_v32 = vpop.f32.mrf.mxu0  ;;  %2996 = vmatmul.bf16.gmra.mxu2 %v5578_v48  ;;  %v2226_v46 = vshrl.u32 %v5578_v48, 16  ;;  %v2229_v58 = vshll.u32 %v5578_v48, 16 }
 0x246   : > { %v1962_v35 = vadd.f32 %v1961_v32, %v1903_v2  ;;  %v2132_v21 = vsel %vm5594_vm5, %v2051_v9, 0.0  ;;  %v1793_v9 = vadd.f32 %v5559_v51, %v5341_v52 }
 0x247   : > { %v2228_v61 = vrot.slane %v2226_v46, 7  ;;  %v2310_v49 = vrot.slane %v2229_v58, 1  ;;  %v2152_v37 = vpack.c.bf16 %v2132_v21, %v2132_v21 }
 0x248   : > { %v2008_v1 = vmul.f32 %v5456_v34, %v1962_v35  ;;  %v1852_v51 = vadd.f32 %v5570_v18, %v1793_v9 }
 0x249   : > { %v2231_v47 = vor.u32 %v2229_v58, %v2228_v61  ;;  %v2311_v20 = vor.u32 %v2310_v49, %v2226_v46  ;;  %v2192_v45 = vunpack.c.l.b16 %v2152_v37  ;;  %v4329_v46 = vld [vmem:[%s6204_s4 + $0x120] sm:$0xff]  ;;  %v1908_v58 = vadd.f32 %v5554_v59, %v1849_v16 }
 0x24a   : > { %v2032_v36 = vadd.f32 %v5464_v15, %v2008_v1  ;;  %3133 = vmatpush.bf16.msrb.mxu2 %v4329_v46  ;;  %v1915_v1 = vpop.f32.mrf.mxu3  ;;  %v1911_v18 = vadd.f32 %v5576_v5, %v1852_v51 }
 0x24b   : > { %v5607_v63 = vsel %vm4706_vm13, 0, %v2231_v47  ;;  %v5611_v6 = vsel %vm4785_vm9, %v2311_v20, 0  ;;  %v1799_v21 = vpop.f32.mrf.mxu1 }
 0x24c   : > { %v2052_v4 = vmax.f32 %v2032_v36, 0.0  ;;  %2947 = vmatmul.bf16.gmra.mxu1 %v5607_v63  ;;  %3045 = vmatmul.bf16.gmra.mxu3 %v5611_v6 }
 0x24d   : > { %v1964_v50 = vpop.f32.mrf.mxu0 }
 0x24e   : > { %v2133_v27 = vsel %vm5594_vm5, %v2052_v4, 0.0  ;;  %v1965_v25 = vadd.f32 %v1964_v50, %v1906_v23 }
 0x24f   : > { %v2153_v54 = vpack.c.bf16 %v2133_v27, %v2133_v27  ;;  %v1795_v27 = vadd.f32 %v5589_v39, %v5345_v8  ;;  %v2072_v8 = vadd.s32 4, %v5471_v24 }
 0x250   : > { %v2009_v0 = vmul.f32 %v5456_v34, %v1965_v25 }
 0x251   : > { %v2193_v14 = vunpack.c.l.b16 %v2153_v54  ;;  %v1858_v54 = vpop.f32.mrf.mxu2  ;;  %v1854_v5 = vadd.f32 %v5600_v17, %v1795_v27  ;;  %v4320_v17 = vld [vmem:[%s6204_s4 + $0xd8] sm:$0xff]  ;;  %vm2082_vm10 = vcmp.ge.s32.totalorder %v2072_v8, 0  ;;  %vm2092_vm11 = vcmp.lt.s32.totalorder %v2072_v8, 16 }
 0x252   : > { %v2033_v2 = vadd.f32 %v5464_v15, %v2009_v0  ;;  %v1917_v39 = vpop.f32.mrf.mxu3  ;;  %3085 = vmatpush.bf16.msrb.mxu1 %v4320_v17  ;;  %vm5684_vm12 = vmand %vm2082_vm10, %vm2092_vm11 }
 0x253   : > { %v5628_v32 = vpack.c.b16 %v2193_v14, %v2192_v45  ;;  %v1802_v9 = vpop.f32.mrf.mxu1 }
 0x254   : > { %v2053_v49 = vmax.f32 %v2033_v2, 0.0 }
 0x255   : > { %v1966_v35 = vpop.f32.mrf.mxu0  ;;  %3001 = vmatmul.bf16.gmra.mxu2 %v5628_v32  ;;  %v2233_v42 = vshrl.u32 %v5628_v32, 16  ;;  %v2236_v61 = vshll.u32 %v5628_v32, 16 }
 0x256   : > { %v1967_v7 = vadd.f32 %v1966_v35, %v1908_v58  ;;  %v2134_v11 = vsel %vm5642_vm8, %v2053_v49, 0.0  ;;  %v1798_v49 = vadd.f32 %v1797_v62, %v5354_v3 }
 0x257   : > { %v2235_v59 = vrot.slane %v2233_v42, 7  ;;  %v2312_v52 = vrot.slane %v2236_v61, 1  ;;  %v2154_v16 = vpack.c.bf16 %v2134_v11, %v2134_v11 }
 0x258   : > { %v2010_v20 = vmul.f32 %v5456_v34, %v1967_v7  ;;  %v1857_v62 = vadd.f32 %v5626_v56, %v1798_v49  ;;  %v1800_v56 = vadd.f32 %v1799_v21, %v5358_v40  ;;  %v2073_v40 = vadd.s32 5, %v5471_v24 }
 0x259   : > { %v2238_v36 = vor.u32 %v2236_v61, %v2235_v59  ;;  %v2313_v23 = vor.u32 %v2312_v52, %v2233_v42  ;;  %v2194_v46 = vunpack.c.l.b16 %v2154_v16  ;;  %v4328_v42 = vld [vmem:[%s6204_s4 + $0x118] sm:$0xff]  ;;  %v1913_v61 = vadd.f32 %v5618_v38, %v1854_v5 }
 0x25a   : > { %v2034_v4 = vadd.f32 %v5464_v15, %v2010_v20  ;;  %3134 = vmatpush.bf16.msrb.mxu2 %v4328_v42  ;;  %v1861_v20 = vpop.f32.mrf.mxu2  ;;  %vm2083_vm14 = vcmp.ge.s32.totalorder %v2073_v40, 0  ;;  %vm2093_vm15 = vcmp.lt.s32.totalorder %v2073_v40, 16 }
 0x25b   : > { %v5653_v37 = vsel %vm4706_vm13, 0, %v2238_v36  ;;  %v5657_v50 = vsel %vm4785_vm9, %v2313_v23, 0  ;;  %vm5722_vm0 = vmand %vm2083_vm14, %vm2093_vm15 }
 0x25c   : > { %v2054_v25 = vmax.f32 %v2034_v4, 0.0  ;;  %2952 = vmatmul.bf16.gmra.mxu1 %v5653_v37  ;;  %3050 = vmatmul.bf16.gmra.mxu3 %v5657_v50 }
 0x25d   : > { %3236 = vmatmul.bf16.vlgmr.msra.gmra.mxu0 %v5653_v37  ;;  %v1969_v0 = vpop.f32.mrf.mxu0 }
 0x25e   : > { %v2135_v31 = vsel %vm5642_vm8, %v2054_v25, 0.0  ;;  %v1970_v45 = vadd.f32 %v1969_v0, %v1911_v18  ;;  %v1920_v25 = vpop.f32.mrf.mxu3 }
 0x25f   : > { %v2155_v14 = vpack.c.bf16 %v2135_v31, %v2135_v31  ;;  %v1916_v31 = vadd.f32 %v1915_v1, %v1857_v62 }
 0x260   : > { %v2011_v2 = vmul.f32 %v5456_v34, %v1970_v45 }
 0x261   : > { %v2195_v28 = vunpack.c.l.b16 %v2155_v14  ;;  %v1804_v14 = vpop.f32.mrf.mxu1 }
 0x262   : > { %v2035_v58 = vadd.f32 %v5464_v15, %v2011_v2  ;;  %v1863_v21 = vpop.f32.mrf.mxu2 }
 0x263   : > { %v5671_v35 = vpack.c.b16 %v2195_v28, %v2194_v46 }
 0x264   : > { %v2055_v52 = vmax.f32 %v2035_v58, 0.0  ;;  %v1859_v58 = vadd.f32 %v1858_v54, %v1800_v56 }
 0x265   : > { %v1971_v7 = vpop.f32.mrf.mxu0  ;;  %3006 = vmatmul.bf16.gmra.mxu2 %v5671_v35  ;;  %v2240_v47 = vshrl.u32 %v5671_v35, 16  ;;  %v2243_v59 = vshll.u32 %v5671_v35, 16 }
 0x266   : > { %v1972_v51 = vadd.f32 %v1971_v7, %v1913_v61  ;;  %v2136_v18 = vsel %vm5684_vm12, %v2055_v52, 0.0  ;;  %v4327_v7 = vld [vmem:[%s6204_s4 + $0x110] sm:$0xff]  ;;  %v1918_v54 = vadd.f32 %v1917_v39, %v1859_v58  ;;  %v1922_v52 = vpop.f32.mrf.mxu3 }
 0x267   : > { %v2242_v38 = vrot.slane %v2240_v47, 7  ;;  %v2314_v3 = vrot.slane %v2243_v59, 1  ;;  %v2156_v5 = vpack.c.bf16 %v2136_v18, %v2136_v18  ;;  %3135 = vmatpush.bf16.msrb.mxu2 %v4327_v7  ;;  %v4339_v7 = vld [vmem:[%s6204_s4 + $0x170] sm:$0xff] }
 0x268   : > { %v2012_v23 = vmul.f32 %v5456_v34, %v1972_v51 }
 0x269   : > { %v2245_v11 = vor.u32 %v2243_v59, %v2242_v38  ;;  %v2315_v4 = vor.u32 %v2314_v3, %v2240_v47  ;;  %v2196_v42 = vunpack.c.l.b16 %v2156_v5  ;;  %v4319_v47 = vld [vmem:[%s6204_s4 + $0xd0] sm:$0xff]  ;;  %v1803_v59 = vadd.f32 %v1802_v9, %v5364_v10 }
 0x26a   : > { %v2036_v27 = vadd.f32 %v5464_v15, %v2012_v23  ;;  %3086 = vmatpush.bf16.msrb.mxu1 %v4319_v47  ;;  %v1807_v23 = vpop.f32.mrf.mxu1 }
 0x26b   : > { %v5695_v16 = vsel %vm4706_vm13, 0, %v2245_v11  ;;  %v5699_v0 = vsel %vm4785_vm9, %v2315_v4, 0  ;;  %v1862_v9 = vadd.f32 %v1861_v20, %v1803_v59  ;;  %v1805_v20 = vadd.f32 %v1804_v14, %v5371_v22  ;;  %v4338_v11 = vld [vmem:[%s6204_s4 + $0x168] sm:$0xff] }
 0x26c   : > { %v2056_v45 = vmax.f32 %v2036_v27, 0.0  ;;  %2957 = vmatmul.bf16.gmra.mxu1 %v5695_v16  ;;  %3055 = vmatmul.bf16.gmra.mxu3 %v5699_v0 }
 0x26d   : > { %3241 = vmatmul.bf16.gmra.mxu0 %v5695_v16  ;;  %v1974_v2 = vpop.f32.mrf.mxu0  ;;  %v1864_v14 = vadd.f32 %v1863_v21, %v1805_v20  ;;  %v4326_v21 = vld [vmem:[%s6204_s4 + $0x108] sm:$0xff] }
 0x26e   : > { %v2137_v8 = vsel %vm5684_vm12, %v2056_v45, 0.0  ;;  %v1975_v46 = vadd.f32 %v1974_v2, %v1916_v31  ;;  %v1866_v45 = vpop.f32.mrf.mxu2  ;;  %3136 = vmatpush.bf16.msrb.mxu2 %v4326_v21 }
 0x26f   : > { %v2157_v28 = vpack.c.bf16 %v2137_v8, %v2137_v8  ;;  %v1921_v8 = vadd.f32 %v1920_v25, %v1862_v9  ;;  %v1925_v25 = vpop.f32.mrf.mxu3 }
 0x270   : > { %v2013_v1 = vmul.f32 %v5456_v34, %v1975_v46 }
 0x271   : > { %v2197_v17 = vunpack.c.l.b16 %v2157_v28  ;;  %v4340_v28 = vld [vmem:[%s6204_s4 + $0x178] sm:$0xff] }
 0x272   : > { %v2037_v61 = vadd.f32 %v5464_v15, %v2013_v1  ;;  %3179 = vmatpush.bf16.msra.mxu3 %v4340_v28  ;;  %v1809_v47 = vpop.f32.mrf.mxu1 }
 0x273   : > { %v5710_v49 = vpack.c.b16 %v2197_v17, %v2196_v42 }
 0x274   : > { %v2057_v3 = vmax.f32 %v2037_v61, 0.0  ;;  %v2074_v61 = vadd.s32 6, %v5471_v24 }
 0x275   : > { %v1976_v51 = vpop.f32.mrf.mxu0  ;;  %3011 = vmatmul.bf16.gmra.mxu2 %v5710_v49  ;;  %v2247_v36 = vshrl.u32 %v5710_v49, 16  ;;  %v2250_v38 = vshll.u32 %v5710_v49, 16 }
 0x276   : > { %v1977_v62 = vadd.f32 %v1976_v51, %v1918_v54  ;;  %v2138_v31 = vsel %vm5722_vm0, %v2057_v3, 0.0  ;;  %3180 = vmatpush.bf16.msra.mxu3 %v4339_v7  ;;  %v1923_v3 = vadd.f32 %v1922_v52, %v1864_v14  ;;  %vm2084_vm1 = vcmp.ge.s32.totalorder %v2074_v61, 0 }
 0x277   : > { %v2249_v10 = vrot.slane %v2247_v36, 7  ;;  %v2316_v39 = vrot.slane %v2250_v38, 1  ;;  %v2158_v58 = vpack.c.bf16 %v2138_v31, %v2138_v31  ;;  %vm2094_vm2 = vcmp.lt.s32.totalorder %v2074_v61, 16  ;;  %v1927_v20 = vpop.f32.mrf.mxu3  ;;  %v4336_v61 = vld [vmem:[%s6204_s4 + $0x158] sm:$0xff] }
 0x278   : > { %v2014_v4 = vmul.f32 %v5456_v34, %v1977_v62  ;;  %v1808_v62 = vadd.f32 %v1807_v23, %v5378_v29  ;;  %vm5768_vm3 = vmand %vm2084_vm1, %vm2094_vm2  ;;  %v1810_v14 = vadd.f32 %v1809_v47, %v5391_v60  ;;  %v6258_v60 = vld [vmem:[#allocation3_spill] sm:$0xff]  ;;  %v4317_v29 = vld [vmem:[%s6204_s4 + $0xc0] sm:$0xff] }
 0x279   : > { %v2252_v18 = vor.u32 %v2250_v38, %v2249_v10  ;;  %v2317_v27 = vor.u32 %v2316_v39, %v2247_v36  ;;  %v2198_v54 = vunpack.c.l.b16 %v2158_v58  ;;  %v4318_v38 = vld [vmem:[%s6204_s4 + $0xc8] sm:$0xff]  ;;  %v1868_v10 = vpop.f32.mrf.mxu2 }
 0x27a   : > { %v2038_v56 = vadd.f32 %v5464_v15, %v2014_v4  ;;  %3087 = vmatpush.bf16.msrb.mxu1 %v4318_v38  ;;  %3181 = vmatpush.bf16.msra.mxu3 %v4338_v11  ;;  %v1867_v31 = vadd.f32 %v1866_v45, %v1808_v62  ;;  %v1869_v38 = vadd.f32 %v1868_v10, %v1810_v14  ;;  %v2075_v62 = vadd.s32 7, %v5471_v24  ;;  %v4335_v11 = vld [vmem:[%s6204_s4 + $0x150] sm:$0xff] }
 0x27b   : > { %v5732_v5 = vsel %vm4706_vm13, 0, %v2252_v18  ;;  %v5736_v2 = vsel %vm4785_vm9, %v2317_v27, 0 }
 0x27c   : > { %v2058_v46 = vmax.f32 %v2038_v56, 0.0  ;;  %2962 = vmatmul.bf16.gmra.mxu1 %v5732_v5  ;;  %3060 = vmatmul.bf16.gmra.mxu3 %v5736_v2  ;;  %vm2085_vm4 = vcmp.ge.s32.totalorder %v2075_v62, 0  ;;  %vm2095_vm5 = vcmp.lt.s32.totalorder %v2075_v62, 16 }
 0x27d   : > { %3246 = vmatmul.bf16.gmra.mxu0 %v5732_v5  ;;  %v1979_v1 = vpop.f32.mrf.mxu0  ;;  %vm5821_vm6 = vmand %vm2085_vm4, %vm2095_vm5 }
 0x27e   : > { %v2139_v40 = vsel %vm5722_vm0, %v2058_v46, 0.0  ;;  %v1980_v42 = vadd.f32 %v1979_v1, %v1921_v8  ;;  %v4337_v8 = vld [vmem:[%s6204_s4 + $0x160] sm:$0xff]  ;;  %3088 = vmatpush.bf16.msrb.mxu1 %v4317_v29 }
 0x27f   : > { %v2159_v22 = vpack.c.bf16 %v2139_v40, %v2139_v40  ;;  %3182 = vmatpush.bf16.msra.mxu3 %v4337_v8  ;;  %v1812_v40 = vpop.f32.mrf.mxu1  ;;  %v1930_v10 = vpop.f32.mrf.mxu3 }
 0x280   : > { %v2015_v17 = vmul.f32 %v5456_v34, %v1980_v42 }
 0x281   : > { %v2199_v59 = vunpack.c.l.b16 %v2159_v22  ;;  %v1926_v22 = vadd.f32 %v1925_v25, %v1867_v31  ;;  %v1579_v25 = vadd.f32 %v6258_v60, %v5201_v30  ;;  %v1871_v47 = vpop.f32.mrf.mxu2  ;;  %v4334_v31 = vld [vmem:[%s6204_s4 + $0x148] sm:$0xff] }
 0x282   : > { %v2039_v51 = vadd.f32 %v5464_v15, %v2015_v17 }
 0x283   : > { %v5753_v36 = vpack.c.b16 %v2199_v59, %v2198_v54  ;;  %3183 = vmatpush.bf16.msra.mxu3 %v4336_v61  ;;  %v1638_v30 = vadd.f32 %v5198_v19, %v1579_v25  ;;  %v4333_v61 = vld [vmem:[%s6204_s4 + $0x140] sm:$0xff] }
 0x284   : > { %v2059_v18 = vmax.f32 %v2039_v51, 0.0 }
 0x285   : > { %v1981_v39 = vpop.f32.mrf.mxu0  ;;  %3016 = vmatmul.bf16.gmra.mxu2 %v5753_v36  ;;  %v2254_v9 = vshrl.u32 %v5753_v36, 16  ;;  %v2257_v4 = vshll.u32 %v5753_v36, 16 }
 0x286   : > { %v1982_v27 = vadd.f32 %v1981_v39, %v1923_v3  ;;  %v2140_v58 = vsel %vm5768_vm3, %v2059_v18, 0.0 }
 0x287   : > { %v2256_v52 = vrot.slane %v2254_v9, 7  ;;  %v2318_v23 = vrot.slane %v2257_v4, 1  ;;  %v2160_v7 = vpack.c.bf16 %v2140_v58, %v2140_v58  ;;  %3184 = vmatpush.bf16.msra.mxu3 %v4335_v11 }
 0x288   : > { %v2016_v56 = vmul.f32 %v5456_v34, %v1982_v27 }
 0x289   : > { %v2259_v46 = vor.u32 %v2257_v4, %v2256_v52  ;;  %v2319_v28 = vor.u32 %v2318_v23, %v2254_v9  ;;  %v2200_v39 = vunpack.c.l.b16 %v2160_v7  ;;  %v4325_v4 = vld [vmem:[%s6204_s4 + $0x100] sm:$0xff]  ;;  %v1928_v52 = vadd.f32 %v1927_v20, %v1869_v38  ;;  %v1873_v7 = vpop.f32.mrf.mxu2  ;;  %v1932_v38 = vpop.f32.mrf.mxu3 }
 0x28a   : > { %v2040_v1 = vadd.f32 %v5464_v15, %v2016_v56  ;;  %3137 = vmatpush.bf16.msrb.mxu2 %v4325_v4  ;;  %v1813_v23 = vadd.f32 %v1812_v40, %v5394_v44  ;;  %v1814_v56 = vpop.f32.mrf.mxu1 }
 0x28b   : > { %v5781_v42 = vsel %vm4706_vm13, 0, %v2259_v46  ;;  %v5785_v45 = vsel %vm4785_vm9, %v2319_v28, 0  ;;  %v1697_v28 = vadd.f32 %v5259_v26, %v1638_v30  ;;  %3185 = vmatpush.bf16.msra.mxu3 %v4334_v31 }
 0x28c   : > { %v2060_v17 = vmax.f32 %v2040_v1, 0.0  ;;  %2967 = vmatmul.bf16.gmra.mxu1 %v5781_v42  ;;  %3065 = vmatmul.bf16.gmra.mxu3 %v5785_v45 }
 0x28d   : > { %3251 = vmatmul.bf16.gmra.mxu0 %v5781_v42  ;;  %v1984_v54 = vpop.f32.mrf.mxu0  ;;  %v1756_v14 = vadd.f32 %v5405_v33, %v1697_v28  ;;  %v4356_v28 = vld [vmem:[%s6204_s4 + $0x1f8] sm:$0xff] }
 0x28e   : > { %v2141_v59 = vsel %vm5768_vm3, %v2060_v17, 0.0  ;;  %v1985_v51 = vadd.f32 %v1984_v54, %v1926_v22  ;;  %v1872_v22 = vadd.f32 %v1871_v47, %v1813_v23  ;;  %3277 = vmatpush.bf16.msra.mxu1 %v4356_v28 }
 0x28f   : > { %v2161_v21 = vpack.c.bf16 %v2141_v59, %v2141_v59  ;;  %3186 = vmatpush.bf16.msra.mxu3 %v4333_v61  ;;  %v1815_v47 = vadd.f32 %v1814_v56, %v1756_v14 }
 0x290   : > { %v2017_v3 = vmul.f32 %v5456_v34, %v1985_v51  ;;  %v1931_v25 = vadd.f32 %v1930_v10, %v1872_v22 }
 0x291   : > { %v2201_v9 = vunpack.c.l.b16 %v2161_v21  ;;  %v1874_v10 = vadd.f32 %v1873_v7, %v1815_v47 }
 0x292   : > { %v2041_v18 = vadd.f32 %v5464_v15, %v2017_v3 }
 0x293   : > { %v5808_v27 = vpack.c.b16 %v2201_v9, %v2200_v39  ;;  %v6261_v9 = vld [vmem:[#allocation4_spill] sm:$0xff] }
 0x294   : > { %v2061_v20 = vmax.f32 %v2041_v18, 0.0  ;;  %v1584_v4 = vadd.f32 %v6261_v9, %v5218_v43  ;;  %v1817_v18 = vpop.f32.mrf.mxu1  ;;  %v4364_v43 = vld [vmem:[%s6204_s4 + $0x238] sm:$0xff] }
 0x295   : > { %v1986_v8 = vpop.f32.mrf.mxu0  ;;  %3021 = vmatmul.bf16.gmra.mxu2 %v5808_v27  ;;  %v2261_v19 = vshrl.u32 %v5808_v27, 16  ;;  %v2264_v46 = vshll.u32 %v5808_v27, 16 }
 0x296   : > { %v1987_v58 = vadd.f32 %v1986_v8, %v1928_v52  ;;  %v2142_v59 = vsel %vm5821_vm6, %v2061_v20, 0.0  ;;  %v2076_v52 = vadd.s32 8, %v5471_v24  ;;  %v1643_v8 = vadd.f32 %v5373_v13, %v1584_v4  ;;  %3326 = vmatpush.bf16.msra.mxu2 %v4364_v43 }
 0x297   : > { %v2263_v1 = vrot.slane %v2261_v19, 7  ;;  %v2320_v40 = vrot.slane %v2264_v46, 1  ;;  %v2162_v3 = vpack.c.bf16 %v2142_v59, %v2142_v59  ;;  %v1933_v20 = vadd.f32 %v1932_v38, %v1874_v10 }
 0x298   : > { %v2018_v17 = vmul.f32 %v5456_v34, %v1987_v58  ;;  %v1818_v58 = vadd.f32 %v1817_v18, %v5423_v12  ;;  %vm2086_vm7 = vcmp.ge.s32.totalorder %v2076_v52, 0  ;;  %vm2096_vm8 = vcmp.lt.s32.totalorder %v2076_v52, 16 }
 0x299   : > { %v2266_v26 = vor.u32 %v2264_v46, %v2263_v1  ;;  %v2321_v54 = vor.u32 %v2320_v40, %v2261_v19  ;;  %v2202_v23 = vunpack.c.l.b16 %v2162_v3  ;;  %v1876_v19 = vpop.f32.mrf.mxu2  ;;  %v1702_v40 = vadd.f32 %v5375_v53, %v1643_v8  ;;  %vm5865_vm10 = vmand %vm2086_vm7, %vm2096_vm8 }
 0x29a   : > { %v2042_v51 = vadd.f32 %v5464_v15, %v2018_v17  ;;  %v1935_v17 = vpop.f32.mrf.mxu3 }
 0x29b   : > { %v5835_v60 = vsel %vm4706_vm13, 0, %v2266_v26  ;;  %v5839_v33 = vsel %vm4785_vm9, %v2321_v54, 0  ;;  %v1877_v26 = vadd.f32 %v1876_v19, %v1818_v58  ;;  %v1761_v54 = vadd.f32 %v5440_v55, %v1702_v40 }
 0x29c   : > { %v2062_v21 = vmax.f32 %v2042_v51, 0.0  ;;  %2972 = vmatmul.bf16.gmra.mxu1 %v5835_v60  ;;  %3070 = vmatmul.bf16.gmra.mxu3 %v5839_v33  ;;  %v4363_v51 = vld [vmem:[%s6204_s4 + $0x230] sm:$0xff]  ;;  %v1819_v53 = vpop.f32.mrf.mxu1 }
 0x29d   : > { %3256 = vmatmul.bf16.gmra.mxu0 %v5835_v60  ;;  %v1989_v62 = vpop.f32.mrf.mxu0  ;;  %3327 = vmatpush.bf16.msra.mxu2 %v4363_v51 }
 0x29e   : > { %v2143_v11 = vsel %vm5821_vm6, %v2062_v21, 0.0  ;;  %v1990_v39 = vadd.f32 %v1989_v62, %v1931_v25  ;;  %v1936_v62 = vadd.f32 %v1935_v17, %v1877_v26 }
 0x29f   : > { %v2163_v30 = vpack.c.bf16 %v2143_v11, %v2143_v11  ;;  %v1820_v11 = vadd.f32 %v1819_v53, %v1761_v54 }
 0x2a0   : > { %v2019_v29 = vmul.f32 %v5456_v34, %v1990_v39 }
 0x2a1   : > { %v2203_v31 = vunpack.c.l.b16 %v2163_v30  ;;  %v1878_v9 = vpop.f32.mrf.mxu2  ;;  %v4355_v30 = vld [vmem:[%s6204_s4 + $0x1f0] sm:$0xff] }
 0x2a2   : > { %v2043_v56 = vadd.f32 %v5464_v15, %v2019_v29  ;;  %3278 = vmatpush.bf16.msra.mxu1 %v4355_v30  ;;  %v1937_v8 = vpop.f32.mrf.mxu3 }
 0x2a3   : > { %v5852_v46 = vpack.c.b16 %v2203_v31, %v2202_v23  ;;  %v1879_v23 = vadd.f32 %v1878_v9, %v1820_v11 }
 0x2a4   : > { %v2063_v22 = vmax.f32 %v2043_v56, 0.0  ;;  %v2077_v56 = vadd.s32 9, %v5471_v24 }
 0x2a5   : > { %v1991_v44 = vpop.f32.mrf.mxu0  ;;  %3026 = vmatmul.bf16.gmra.mxu2 %v5852_v46  ;;  %v2268_v13 = vshrl.u32 %v5852_v46, 16  ;;  %v2271_v1 = vshll.u32 %v5852_v46, 16  ;;  %v1938_v58 = vadd.f32 %v1937_v8, %v1879_v23  ;;  %v4361_v8 = vld [vmem:[%s6204_s4 + $0x220] sm:$0xff] }
 0x2a6   : > { %v1992_v14 = vadd.f32 %v1991_v44, %v1933_v20  ;;  %v2144_v21 = vsel %vm5865_vm10, %v2063_v22, 0.0  ;;  %vm2087_vm11 = vcmp.ge.s32.totalorder %v2077_v56, 0  ;;  %vm2097_vm12 = vcmp.lt.s32.totalorder %v2077_v56, 16 }
 0x2a7   : > { %v2270_v12 = vrot.slane %v2268_v13, 7  ;;  %v2322_v7 = vrot.slane %v2271_v1, 1  ;;  %v2164_v4 = vpack.c.bf16 %v2144_v21, %v2144_v21  ;;  %vm5901_vm14 = vmand %vm2087_vm11, %vm2097_vm12 }
 0x2a8   : > { %v2020_v59 = vmul.f32 %v5456_v34, %v1992_v14 }
 0x2a9   : > { %v2273_v25 = vor.u32 %v2271_v1, %v2270_v12  ;;  %v2323_v47 = vor.u32 %v2322_v7, %v2268_v13  ;;  %v2204_v19 = vunpack.c.l.b16 %v2164_v4  ;;  %v4362_v7 = vld [vmem:[%s6204_s4 + $0x228] sm:$0xff] }
 0x2aa   : > { %v2044_v38 = vadd.f32 %v5464_v15, %v2020_v59  ;;  %3328 = vmatpush.bf16.msra.mxu2 %v4362_v7 }
 0x2ab   : > { %v5879_v3 = vsel %vm4706_vm13, 0, %v2273_v25  ;;  %v5883_v55 = vsel %vm4785_vm9, %v2323_v47, 0  ;;  %v4354_v47 = vld [vmem:[%s6204_s4 + $0x1e8] sm:$0xff] }
 0x2ac   : > { %v2064_v39 = vmax.f32 %v2044_v38, 0.0  ;;  %2977 = vmatmul.bf16.gmra.mxu1 %v5879_v3  ;;  %3075 = vmatmul.bf16.gmra.mxu3 %v5883_v55 }
 0x2ad   : > { %3261 = vmatmul.bf16.gmra.mxu0 %v5879_v3  ;;  %v1994_v18 = vpop.f32.mrf.mxu0  ;;  %3279 = vmatpush.bf16.msra.mxu1 %v4354_v47 }
 0x2ae   : > { %v2145_v10 = vsel %vm5865_vm10, %v2064_v39, 0.0  ;;  %v1995_v29 = vadd.f32 %v1994_v18, %v1936_v62  ;;  %3329 = vmatpush.bf16.msra.mxu2 %v4361_v8  ;;  %v4350_v8 = vld [vmem:[%s6204_s4 + $0x1c8] sm:$0xff] }
 0x2af   : > { %v2165_v52 = vpack.c.bf16 %v2145_v10, %v2145_v10 }
 0x2b0   : > { %v2021_v31 = vmul.f32 %v5456_v34, %v1995_v29 }
 0x2b1   : > { %v2205_v43 = vunpack.c.l.b16 %v2165_v52 }
 0x2b2   : > { %v2045_v28 = vadd.f32 %v5464_v15, %v2021_v31 }
 0x2b3   : > { %v5896_v20 = vpack.c.b16 %v2205_v43, %v2204_v19 }
 0x2b4   : > { %v2065_v40 = vmax.f32 %v2045_v28, 0.0 }
 0x2b5   : > { %v1996_v44 = vpop.f32.mrf.mxu0  ;;  %3138 = vmatmul.bf16.vlgmr.msrb.gmra.mxu2 %v5578_v48  ;;  %v2275_v13 = vshrl.u32 %v5896_v20, 16  ;;  %v2278_v1 = vshll.u32 %v5896_v20, 16 }
 0x2b6   : > { %v1997_v22 = vadd.f32 %v1996_v44, %v1938_v58  ;;  %v2146_v59 = vsel %vm5901_vm14, %v2065_v40, 0.0 }
 0x2b7   : > { %v2277_v14 = vrot.slane %v2275_v13, 7  ;;  %v2324_v17 = vrot.slane %v2278_v1, 1  ;;  %v2166_v21 = vpack.c.bf16 %v2146_v59, %v2146_v59 }
 0x2b8   : > { %v2022_v61 = vmul.f32 %v5456_v34, %v1997_v22  ;;  %v2992_v12 = vpop.f32.mrf.mxu2 }
 0x2b9   : > { %v2943_v48 = vpop.f32.mrf.mxu1  ;;  %v2280_v26 = vor.u32 %v2278_v1, %v2277_v14  ;;  %v5909_v54 = vor.u32 %v2324_v17, %v2275_v13  ;;  %v2206_v9 = vunpack.c.l.b16 %v2166_v21  ;;  %v4353_v13 = vld [vmem:[%s6204_s4 + $0x1e0] sm:$0xff] }
 0x2ba   : > { %v2046_v51 = vadd.f32 %v5464_v15, %v2022_v61  ;;  %v2993_v53 = vadd.f32 %v2992_v12, %v2943_v48  ;;  %3280 = vmatpush.bf16.msra.mxu1 %v4353_v13  ;;  %v4360_v61 = vld [vmem:[%s6204_s4 + $0x218] sm:$0xff] }
 0x2bb   : > { %v5916_v25 = vsel %vm4706_vm13, 0, %v2280_v26  ;;  %3330 = vmatpush.bf16.msra.mxu2 %v4360_v61  ;;  %v4352_v48 = vld [vmem:[%s6204_s4 + $0x1d8] sm:$0xff] }
 0x2bc   : > { %v2066_v34 = vmax.f32 %v2046_v51, 0.0  ;;  %3089 = vmatmul.bf16.vlgmr.msrb.gmra.mxu1 %v5607_v63  ;;  %3187 = vmatmul.bf16.vlgmr.msra.gmra.mxu3 %v5611_v6 }
 0x2bd   : > { %3266 = vmatmul.bf16.gmra.mxu0 %v5916_v25 }
 0x2be   : > { %v2147_v15 = vsel %vm5901_vm14, %v2066_v34, 0.0  ;;  %3281 = vmatpush.bf16.msra.mxu1 %v4352_v48 }
 0x2bf   : > { %v2167_v38 = vpack.c.bf16 %v2147_v15, %v2147_v15  ;;  %v3041_v62 = vpop.f32.mrf.mxu3 }
 0x2c0   : > { %v5926_v11 = vadd.f32 %v3041_v62, %v2993_v53  ;;  %v2994_v39 = vpop.f32.mrf.mxu2 }
 0x2c1   : > { %v2207_v63 = vunpack.c.l.b16 %v2167_v38  ;;  %v2945_v4 = vpop.f32.mrf.mxu1 }
 0x2c2   : > { %v2995_v6 = vadd.f32 %v2994_v39, %v2945_v4  ;;  %v4351_v39 = vld [vmem:[%s6204_s4 + $0x1d0] sm:$0xff] }
 0x2c3   : > { %v5928_v18 = vpack.c.b16 %v2207_v63, %v2206_v9  ;;  %3282 = vmatpush.bf16.msra.mxu1 %v4351_v39 }
 0x2c5   : > { %3143 = vmatmul.bf16.gmra.mxu2 %v5628_v32  ;;  %v2282_v30 = vshrl.u32 %v5928_v18, 16  ;;  %v2285_v10 = vshll.u32 %v5928_v18, 16 }
 0x2c7   : > { %v3043_v29 = vpop.f32.mrf.mxu3  ;;  %v2284_v52 = vrot.slane %v2282_v30, 7  ;;  %v2326_v23 = vrot.slane %v2285_v10, 1  ;;  %3283 = vmatpush.bf16.msra.mxu1 %v4350_v8 }
 0x2c8   : > { %v5933_v31 = vadd.f32 %v3043_v29, %v2995_v6  ;;  %v2997_v56 = vpop.f32.mrf.mxu2 }
 0x2c9   : > { %v2948_v19 = vpop.f32.mrf.mxu1  ;;  %v2287_v43 = vor.u32 %v2285_v10, %v2284_v52  ;;  %v5938_v28 = vor.u32 %v2326_v23, %v2282_v30 }
 0x2ca   : > { %v2998_v58 = vadd.f32 %v2997_v56, %v2948_v19 }
 0x2cb   : > { %v2307_v44 = vsel %vm4706_vm13, 0, %v2287_v43 }
 0x2cc   : > { %3094 = vmatmul.bf16.gmra.mxu1 %v5653_v37  ;;  %3192 = vmatmul.bf16.gmra.mxu3 %v5657_v50 }
 0x2cd   : > { %3271 = vmatmul.bf16.gmra.mxu0 %v2307_v44 }
 0x2cf   : > { %v3046_v1 = vpop.f32.mrf.mxu3 }
 0x2d0   : > { %v5947_v40 = vadd.f32 %v3046_v1, %v2998_v58  ;;  %v2999_v22 = vpop.f32.mrf.mxu2 }
 0x2d1   : > { %v2950_v24 = vpop.f32.mrf.mxu1 }
 0x2d2   : > { %v3000_v14 = vadd.f32 %v2999_v22, %v2950_v24 }
 0x2d5   : > { %3148 = vmatmul.bf16.gmra.mxu2 %v5671_v35 }
 0x2d7   : > { %v3048_v57 = vpop.f32.mrf.mxu3 }
 0x2d8   : > { %v5950_v17 = vadd.f32 %v3048_v57, %v3000_v14  ;;  %v3002_v37 = vpop.f32.mrf.mxu2 }
 0x2d9   : > { %v2953_v12 = vpop.f32.mrf.mxu1 }
 0x2da   : > { %v3003_v7 = vadd.f32 %v3002_v37, %v2953_v12  ;;  %v4349_v37 = vld [vmem:[%s6204_s4 + $0x1c0] sm:$0xff] }
 0x2db   : > { %3284 = vmatpush.bf16.msra.mxu1 %v4349_v37 }
 0x2dc   : > { %3099 = vmatmul.bf16.gmra.mxu1 %v5695_v16  ;;  %3197 = vmatmul.bf16.gmra.mxu3 %v5699_v0  ;;  %v4359_v16 = vld [vmem:[%s6204_s4 + $0x210] sm:$0xff] }
 0x2dd   : > { %3331 = vmatpush.bf16.msra.mxu2 %v4359_v16 }
 0x2df   : > { %v3051_v26 = vpop.f32.mrf.mxu3 }
 0x2e0   : > { %v5960_v59 = vadd.f32 %v3051_v26, %v3003_v7  ;;  %v3004_v51 = vpop.f32.mrf.mxu2 }
 0x2e1   : > { %v2955_v53 = vpop.f32.mrf.mxu1 }
 0x2e2   : > { %v3005_v34 = vadd.f32 %v3004_v51, %v2955_v53 }
 0x2e5   : > { %3153 = vmatmul.bf16.gmra.mxu2 %v5710_v49 }
 0x2e7   : > { %v3053_v47 = vpop.f32.mrf.mxu3 }
 0x2e8   : > { %v5963_v21 = vadd.f32 %v3053_v47, %v3005_v34  ;;  %v3007_v15 = vpop.f32.mrf.mxu2 }
 0x2e9   : > { %v2958_v38 = vpop.f32.mrf.mxu1 }
 0x2ea   : > { %v3008_v62 = vadd.f32 %v3007_v15, %v2958_v38 }
 0x2ec   : > { %3104 = vmatmul.bf16.gmra.mxu1 %v5732_v5  ;;  %3202 = vmatmul.bf16.gmra.mxu3 %v5736_v2  ;;  %v4358_v5 = vld [vmem:[%s6204_s4 + $0x208] sm:$0xff] }
 0x2ed   : > { %3332 = vmatpush.bf16.msra.mxu2 %v4358_v5 }
 0x2ef   : > { %v3056_v9 = vpop.f32.mrf.mxu3 }
 0x2f0   : > { %v5973_v63 = vadd.f32 %v3056_v9, %v3008_v62  ;;  %v3009_v4 = vpop.f32.mrf.mxu2 }
 0x2f1   : > { %v2960_v6 = vpop.f32.mrf.mxu1 }
 0x2f2   : > { %v3010_v30 = vadd.f32 %v3009_v4, %v2960_v6 }
 0x2f5   : > { %3158 = vmatmul.bf16.gmra.mxu2 %v5753_v36 }
 0x2f7   : > { %v3058_v10 = vpop.f32.mrf.mxu3 }
 0x2f8   : > { %v5976_v29 = vadd.f32 %v3058_v10, %v3010_v30  ;;  %v3012_v52 = vpop.f32.mrf.mxu2 }
 0x2f9   : > { %v2963_v23 = vpop.f32.mrf.mxu1 }
 0x2fa   : > { %v3013_v56 = vadd.f32 %v3012_v52, %v2963_v23 }
 0x2fc   : > { %3109 = vmatmul.bf16.gmra.mxu1 %v5781_v42  ;;  %3207 = vmatmul.bf16.gmra.mxu3 %v5785_v45  ;;  %v4357_v42 = vld [vmem:[%s6204_s4 + $0x200] sm:$0xff] }
 0x2fd   : > { %3333 = vmatpush.bf16.msra.mxu2 %v4357_v42 }
 0x2ff   : > { %v3061_v19 = vpop.f32.mrf.mxu3 }
 0x300   : > { %v5986_v43 = vadd.f32 %v3061_v19, %v3013_v56  ;;  %v3014_v58 = vpop.f32.mrf.mxu2 }
 0x301   : > { %v2965_v44 = vpop.f32.mrf.mxu1 }
 0x302   : > { %v3015_v13 = vadd.f32 %v3014_v58, %v2965_v44 }
 0x305   : > { %3163 = vmatmul.bf16.gmra.mxu2 %v5808_v27 }
 0x307   : > { %v3063_v1 = vpop.f32.mrf.mxu3 }
 0x308   : > { %v5989_v22 = vadd.f32 %v3063_v1, %v3015_v13  ;;  %v3017_v24 = vpop.f32.mrf.mxu2 }
 0x309   : > { %v2968_v14 = vpop.f32.mrf.mxu1 }
 0x30a   : > { %v3018_v57 = vadd.f32 %v3017_v24, %v2968_v14 }
 0x30c   : > { %3114 = vmatmul.bf16.gmra.mxu1 %v5835_v60  ;;  %3212 = vmatmul.bf16.gmra.mxu3 %v5839_v33 }
 0x30f   : > { %v3066_v61 = vpop.f32.mrf.mxu3 }
 0x310   : > { %v5999_v12 = vadd.f32 %v3066_v61, %v3018_v57  ;;  %v3019_v7 = vpop.f32.mrf.mxu2 }
 0x311   : > { %v2970_v48 = vpop.f32.mrf.mxu1 }
 0x312   : > { %v3020_v26 = vadd.f32 %v3019_v7, %v2970_v48 }
 0x315   : > { %3168 = vmatmul.bf16.gmra.mxu2 %v5852_v46 }
 0x317   : > { %v3068_v51 = vpop.f32.mrf.mxu3 }
 0x318   : > { %v6002_v53 = vadd.f32 %v3068_v51, %v3020_v26  ;;  %v3022_v34 = vpop.f32.mrf.mxu2 }
 0x319   : > { %v2973_v60 = vpop.f32.mrf.mxu1 }
 0x31a   : > { %v3023_v47 = vadd.f32 %v3022_v34, %v2973_v60 }
 0x31c   : > { %3119 = vmatmul.bf16.gmra.mxu1 %v5879_v3  ;;  %3217 = vmatmul.bf16.gmra.mxu3 %v5883_v55  ;;  %v6014_v3 = vsel %vm4785_vm9, %v5909_v54, 0 }
 0x31f   : > { %v3071_v15 = vpop.f32.mrf.mxu3 }
 0x320   : > { %v6006_v16 = vadd.f32 %v3071_v15, %v3023_v47  ;;  %v3024_v38 = vpop.f32.mrf.mxu2 }
 0x321   : > { %v2975_v62 = vpop.f32.mrf.mxu1 }
 0x322   : > { %v3025_v39 = vadd.f32 %v3024_v38, %v2975_v62 }
 0x325   : > { %3173 = vmatmul.bf16.gmra.mxu2 %v5896_v20 }
 0x327   : > { %v3073_v9 = vpop.f32.mrf.mxu3 }
 0x328   : > { %v6009_v4 = vadd.f32 %v3073_v9, %v3025_v39  ;;  %v3027_v6 = vpop.f32.mrf.mxu2 }
 0x329   : > { %v2978_v30 = vpop.f32.mrf.mxu1 }
 0x32a   : > { %v3028_v10 = vadd.f32 %v3027_v6, %v2978_v30 }
 0x32c   : > { %3124 = vmatmul.bf16.gmra.mxu1 %v5916_v25  ;;  %3222 = vmatmul.bf16.gmra.mxu3 %v6014_v3 }
 0x32f   : > { %v3076_v52 = vpop.f32.mrf.mxu3 }
 0x330   : > { %v6018_v5 = vadd.f32 %v3076_v52, %v3028_v10  ;;  %v3029_v23 = vpop.f32.mrf.mxu2 }
 0x331   : > { %v2980_v56 = vpop.f32.mrf.mxu1 }
 0x332   : > { %v3030_v8 = vadd.f32 %v3029_v23, %v2980_v56 }
 0x335   : > { %3334 = vmatmul.bf16.vlgmr.msra.gmra.mxu2 %v5657_v50 }
 0x337   : > { %v3078_v19 = vpop.f32.mrf.mxu3 }
 0x338   : > { %v6021_v58 = vadd.f32 %v3078_v19, %v3030_v8  ;;  %v3139_v44 = vpop.f32.mrf.mxu2  ;;  %v3237_v19 = vpop.f32.mrf.mxu0 }
 0x339   : > { %v3090_v13 = vpop.f32.mrf.mxu1 }
 0x33a   : > { %v3091_v54 = vadd.f32 %v3090_v13, %v5926_v11 }
 0x33c   : > { %3285 = vmatmul.bf16.vlgmr.msra.gmra.mxu1 %v5628_v32  ;;  %v6025_v25 = vadd.f32 %v3139_v44, %v3091_v54 }
 0x33f   : > { %v3188_v23 = vpop.f32.mrf.mxu3 }
 0x340   : > { %v3141_v1 = vpop.f32.mrf.mxu2  ;;  %v3189_v41 = vadd.f32 %v3188_v23, %v6025_v25  ;;  %v6098_v25 = vld [vmem:[%s6208_s8] ss:$0 sm:$0xff]  ;;  %v4426_v23 = vld [vmem:[%s4604_s29 + $0x8] sm:$0xff] }
 0x341   : > { %v3092_v24 = vpop.f32.mrf.mxu1 }
 0x342   : > { %v3093_v42 = vadd.f32 %v3092_v24, %v5933_v31  ;;  %v3239_v24 = vpop.f32.mrf.mxu0 }
 0x344   : > { %v6028_v14 = vadd.f32 %v3141_v1, %v3093_v42 }
 0x345   : > { %3339 = vmatmul.bf16.gmra.mxu2 %v5699_v0 }
 0x347   : > { %v3190_v13 = vpop.f32.mrf.mxu3 }
 0x348   : > { %v3144_v50 = vpop.f32.mrf.mxu2 }
 0x349   : > { %v3095_v57 = vpop.f32.mrf.mxu1 }
 0x34a   : > { %v3096_v37 = vadd.f32 %v3095_v57, %v5947_v40 }
 0x34c   : > { %3290 = vmatmul.bf16.gmra.mxu1 %v5671_v35  ;;  %v6033_v61 = vadd.f32 %v3144_v50, %v3096_v37  ;;  %v3242_v37 = vpop.f32.mrf.mxu0 }
 0x34f   : > { %v3193_v42 = vpop.f32.mrf.mxu3 }
 0x350   : > { %v3146_v11 = vpop.f32.mrf.mxu2 }
 0x351   : > { %v3097_v32 = vpop.f32.mrf.mxu1 }
 0x352   : > { %v3098_v7 = vadd.f32 %v3097_v32, %v5950_v17 }
 0x354   : > { %v6036_v48 = vadd.f32 %v3146_v11, %v3098_v7 }
 0x355   : > { %3344 = vmatmul.bf16.gmra.mxu2 %v5736_v2 }
 0x357   : > { %v3195_v11 = vpop.f32.mrf.mxu3 }
 0x358   : > { %v3149_v31 = vpop.f32.mrf.mxu2 }
 0x359   : > { %v3100_v26 = vpop.f32.mrf.mxu1 }
 0x35a   : > { %v3101_v0 = vadd.f32 %v3100_v26, %v5960_v59 }
 0x35c   : > { %3295 = vmatmul.bf16.gmra.mxu1 %v5710_v49  ;;  %v6041_v51 = vadd.f32 %v3149_v31, %v3101_v0  ;;  %v3244_v31 = vpop.f32.mrf.mxu0  ;;  %v3238_v0 = vadd.f32 %v3237_v19, %v3189_v41 }
 0x360   : > { %v3151_v40 = vpop.f32.mrf.mxu2 }
 0x361   : > { %v3102_v35 = vpop.f32.mrf.mxu1 }
 0x362   : > { %v3103_v34 = vadd.f32 %v3102_v35, %v5963_v21  ;;  %v6092_v35 = vld [vmem:[%s6207_s7] ss:$0 sm:$0xff] }
 0x364   : > { %v6044_v60 = vadd.f32 %v3151_v40, %v3103_v34  ;;  %v3191_v34 = vadd.f32 %v3190_v13, %v6028_v14  ;;  %v3194_v14 = vadd.f32 %v3193_v42, %v6033_v61  ;;  %v4427_v42 = vld [vmem:[%s4604_s29 + $0x10] sm:$0xff] }
 0x365   : > { %3349 = vmatmul.bf16.gmra.mxu2 %v5785_v45 }
 0x368   : > { %v3154_v17 = vpop.f32.mrf.mxu2 }
 0x369   : > { %v3105_v47 = vpop.f32.mrf.mxu1 }
 0x36a   : > { %v3106_v2 = vadd.f32 %v3105_v47, %v5973_v63 }
 0x36c   : > { %3300 = vmatmul.bf16.gmra.mxu1 %v5753_v36  ;;  %v6049_v15 = vadd.f32 %v3154_v17, %v3106_v2 }
 0x370   : > { %v3156_v59 = vpop.f32.mrf.mxu2 }
 0x371   : > { %v3107_v49 = vpop.f32.mrf.mxu1 }
 0x372   : > { %v3108_v38 = vadd.f32 %v3107_v49, %v5976_v29  ;;  %v3247_v49 = vpop.f32.mrf.mxu0 }
 0x374   : > { %v6052_v62 = vadd.f32 %v3156_v59, %v3108_v38  ;;  %v3240_v59 = vadd.f32 %v3239_v24, %v3191_v34 }
 0x375   : > { %3354 = vmatmul.bf16.gmra.mxu2 %v5839_v33 }
 0x378   : > { %v3159_v21 = vpop.f32.mrf.mxu2 }
 0x379   : > { %v3110_v39 = vpop.f32.mrf.mxu1 }
 0x37a   : > { %v3111_v45 = vadd.f32 %v3110_v39, %v5986_v43  ;;  %v3249_v19 = vpop.f32.mrf.mxu0 }
 0x37c   : > { %3305 = vmatmul.bf16.gmra.mxu1 %v5808_v27  ;;  %v6057_v9 = vadd.f32 %v3159_v21, %v3111_v45  ;;  %v4425_v21 = vld [vmem:[%s4604_s29] sm:$0xff] }
 0x380   : > { %v3161_v63 = vpop.f32.mrf.mxu2 }
 0x381   : > { %v3112_v36 = vpop.f32.mrf.mxu1 }
 0x382   : > { %v3113_v6 = vadd.f32 %v3112_v36, %v5989_v22 }
 0x384   : > { %v6060_v30 = vadd.f32 %v3161_v63, %v3113_v6 }
 0x385   : > { %3359 = vmatmul.bf16.gmra.mxu2 %v5883_v55 }
 0x388   : > { %v3164_v29 = vpop.f32.mrf.mxu2 }
 0x389   : > { %v3115_v10 = vpop.f32.mrf.mxu1 }
 0x38a   : > { %v3116_v33 = vadd.f32 %v3115_v10, %v5999_v12 }
 0x38c   : > { %3310 = vmatmul.bf16.gmra.mxu1 %v5852_v46  ;;  %v6065_v52 = vadd.f32 %v3164_v29, %v3116_v33 }
 0x390   : > { %v3166_v43 = vpop.f32.mrf.mxu2 }
 0x391   : > { %v3117_v27 = vpop.f32.mrf.mxu1 }
 0x392   : > { %v3118_v56 = vadd.f32 %v3117_v27, %v6002_v53  ;;  %v2347_v53 = vsel %vm4785_vm9, %v5938_v28, 0 }
 0x394   : > { %v6068_v8 = vadd.f32 %v3166_v43, %v3118_v56  ;;  %v3243_v43 = vadd.f32 %v3242_v37, %v3194_v14 }
 0x395   : > { %3364 = vmatmul.bf16.gmra.mxu2 %v6014_v3 }
 0x398   : > { %v3169_v22 = vpop.f32.mrf.mxu2 }
 0x399   : > { %v3120_v55 = vpop.f32.mrf.mxu1 }
 0x39a   : > { %v3121_v44 = vadd.f32 %v3120_v55, %v6006_v16  ;;  %v3196_v55 = vadd.f32 %v3195_v11, %v6036_v48  ;;  %v3252_v11 = vpop.f32.mrf.mxu0 }
 0x39c   : > { %3315 = vmatmul.bf16.gmra.mxu1 %v5896_v20  ;;  %v6073_v46 = vadd.f32 %v3169_v22, %v3121_v44  ;;  %v3245_v24 = vadd.f32 %v3244_v31, %v3196_v55 }
 0x3a0   : > { %v3171_v12 = vpop.f32.mrf.mxu2 }
 0x3a1   : > { %v3122_v54 = vpop.f32.mrf.mxu1 }
 0x3a2   : > { %v3123_v1 = vadd.f32 %v3122_v54, %v6009_v4 }
 0x3a4   : > { %v6079_v3 = vadd.f32 %v3171_v12, %v3123_v1 }
 0x3a5   : > { %3369 = vmatmul.bf16.gmra.mxu2 %v2347_v53 }
 0x3a8   : > { %v3174_v50 = vpop.f32.mrf.mxu2 }
 0x3a9   : > { %v3125_v16 = vpop.f32.mrf.mxu1 }
 0x3aa   : > { %v3126_v57 = vadd.f32 %v3125_v16, %v6018_v5  ;;  %v3198_v5 = vpop.f32.mrf.mxu3 }
 0x3ac   : > { %3320 = vmatmul.bf16.gmra.mxu1 %v5928_v18  ;;  %v6083_v20 = vadd.f32 %v3174_v50, %v3126_v57  ;;  %v3199_v57 = vadd.f32 %v3198_v5, %v6041_v51 }
 0x3b0   : > { %v3176_v4 = vpop.f32.mrf.mxu2 }
 0x3b1   : > { %v3127_v32 = vpop.f32.mrf.mxu1 }
 0x3b2   : > { %v3128_v7 = vadd.f32 %v3127_v32, %v6021_v58  ;;  %v3200_v63 = vpop.f32.mrf.mxu3 }
 0x3b3   : > { %v3201_v34 = vadd.f32 %v3200_v63, %v6044_v60 }
 0x3b4   : > { %v6087_v28 = vadd.f32 %v3176_v4, %v3128_v7 }
 0x3b8   : > { %v3335_v26 = vpop.f32.mrf.mxu2 }
 0x3b9   : > { %v3286_v40 = vpop.f32.mrf.mxu1 }
 0x3ba   : > { %v3287_v18 = vadd.f32 %v3286_v40, %v3238_v0  ;;  %v3203_v13 = vpop.f32.mrf.mxu3  ;;  %v4428_v0 = vld [vmem:[%s4604_s29 + $0x18] sm:$0xff] }
 0x3bb   : > { %v3204_v14 = vadd.f32 %v3203_v13, %v6049_v15 }
 0x3bc   : > { %v3336_v58 = vadd.f32 %v3335_v26, %v3287_v18  ;;  %v3248_v26 = vadd.f32 %v3247_v49, %v3199_v57 }
 0x3be   : > { %v3379_v17 = vmul.f32 %v6092_v35, %v3336_v58 }
 0x3c0   : > { %v3399_v47 = vadd.f32 %v6098_v25, %v3379_v17  ;;  %v3337_v2 = vpop.f32.mrf.mxu2  ;;  %v3254_v17 = vpop.f32.mrf.mxu0 }
 0x3c1   : > { %v3288_v38 = vpop.f32.mrf.mxu1 }
 0x3c2   : > { %v3415_v39 = vadd.f32 %v4425_v21, %v3399_v47  ;;  %v3289_v45 = vadd.f32 %v3288_v38, %v3240_v59  ;;  %v3205_v32 = vpop.f32.mrf.mxu3  ;;  %v3250_v59 = vadd.f32 %v3249_v19, %v3201_v34  ;;  %v4429_v21 = vld [vmem:[%s4604_s29 + $0x20] sm:$0xff] }
 0x3c4   : > { %v3431_v36 = vmax.f32 %v3415_v39, 0.0  ;;  %v3338_v6 = vadd.f32 %v3337_v2, %v3289_v45 }
 0x3c6   : > { %3447 = vst [vmem:[%s6108_s21] sm:$0xff] %v3431_v36  ;;  %v3380_v29 = vmul.f32 %v6092_v35, %v3338_v6 }
 0x3c8   : > { %v3400_v10 = vadd.f32 %v6098_v25, %v3380_v29  ;;  %v3340_v33 = vpop.f32.mrf.mxu2 }
 0x3c9   : > { %v3291_v27 = vpop.f32.mrf.mxu1 }
 0x3ca   : > { %v3416_v56 = vadd.f32 %v4426_v23, %v3400_v10  ;;  %v3292_v22 = vadd.f32 %v3291_v27, %v3243_v43  ;;  %v3208_v38 = vpop.f32.mrf.mxu3  ;;  %v3253_v10 = vadd.f32 %v3252_v11, %v3204_v14  ;;  %v4430_v27 = vld [vmem:[%s4604_s29 + $0x28] sm:$0xff] }
 0x3cc   : > { %v3432_v61 = vmax.f32 %v3416_v56, 0.0  ;;  %v3341_v44 = vadd.f32 %v3340_v33, %v3292_v22  ;;  %v3257_v33 = vpop.f32.mrf.mxu0  ;;  %v3206_v22 = vadd.f32 %v3205_v32, %v6052_v62 }
 0x3ce   : > { %3448 = vst [vmem:[%s6108_s21 + $0x8] sm:$0xff] %v3432_v61  ;;  %v3381_v12 = vmul.f32 %v6092_v35, %v3341_v44 }
 0x3d0   : > { %v3401_v54 = vadd.f32 %v6098_v25, %v3381_v12  ;;  %v3342_v1 = vpop.f32.mrf.mxu2  ;;  %v3255_v12 = vadd.f32 %v3254_v17, %v3206_v22 }
 0x3d1   : > { %v3293_v53 = vpop.f32.mrf.mxu1 }
 0x3d2   : > { %v3417_v50 = vadd.f32 %v4427_v42, %v3401_v54  ;;  %v3294_v16 = vadd.f32 %v3293_v53, %v3245_v24  ;;  %v3210_v19 = vpop.f32.mrf.mxu3 }
 0x3d4   : > { %v3433_v37 = vmax.f32 %v3417_v50, 0.0  ;;  %v3343_v48 = vadd.f32 %v3342_v1, %v3294_v16  ;;  %v4431_v1 = vld [vmem:[%s4604_s29 + $0x30] sm:$0xff]  ;;  %v3259_v42 = vpop.f32.mrf.mxu0  ;;  %v3209_v50 = vadd.f32 %v3208_v38, %v6057_v9 }
 0x3d6   : > { %3449 = vst [vmem:[%s6108_s21 + $0x10] sm:$0xff] %v3433_v37  ;;  %v3382_v4 = vmul.f32 %v6092_v35, %v3343_v48 }
 0x3d8   : > { %v3402_v7 = vadd.f32 %v6098_v25, %v3382_v4  ;;  %v3345_v41 = vpop.f32.mrf.mxu2  ;;  %v3258_v4 = vadd.f32 %v3257_v33, %v3209_v50 }
 0x3d9   : > { %v3296_v31 = vpop.f32.mrf.mxu1 }
 0x3da   : > { %v3418_v40 = vadd.f32 %v4428_v0, %v3402_v7  ;;  %v3297_v18 = vadd.f32 %v3296_v31, %v3248_v26  ;;  %v3213_v57 = vpop.f32.mrf.mxu3  ;;  %v4432_v7 = vld [vmem:[%s4604_s29 + $0x38] sm:$0xff]  ;;  %v3211_v31 = vadd.f32 %v3210_v19, %v6060_v30 }
 0x3dc   : > { %v3434_v51 = vmax.f32 %v3418_v40, 0.0  ;;  %v3346_v5 = vadd.f32 %v3345_v41, %v3297_v18  ;;  %v3262_v40 = vpop.f32.mrf.mxu0 }
 0x3de   : > { %3450 = vst [vmem:[%s6108_s21 + $0x18] sm:$0xff] %v3434_v51  ;;  %v3383_v58 = vmul.f32 %v6092_v35, %v3346_v5 }
 0x3e0   : > { %v3403_v47 = vadd.f32 %v6098_v25, %v3383_v58  ;;  %v3347_v2 = vpop.f32.mrf.mxu2  ;;  %v3260_v58 = vadd.f32 %v3259_v42, %v3211_v31 }
 0x3e1   : > { %v3298_v49 = vpop.f32.mrf.mxu1 }
 0x3e2   : > { %v3419_v39 = vadd.f32 %v4429_v21, %v3403_v47  ;;  %v3299_v45 = vadd.f32 %v3298_v49, %v3250_v59  ;;  %v3215_v34 = vpop.f32.mrf.mxu3  ;;  %v4433_v47 = vld [vmem:[%s4604_s29 + $0x40] sm:$0xff]  ;;  %v3214_v49 = vadd.f32 %v3213_v57, %v6065_v52 }
 0x3e3   : > { %v3216_v33 = vadd.f32 %v3215_v34, %v6068_v8 }
 0x3e4   : > { %v3435_v60 = vmax.f32 %v3419_v39, 0.0  ;;  %v3348_v63 = vadd.f32 %v3347_v2, %v3299_v45  ;;  %v3264_v39 = vpop.f32.mrf.mxu0 }
 0x3e5   : > { %v3265_v22 = vadd.f32 %v3264_v39, %v3216_v33 }
 0x3e6   : > { %3451 = vst [vmem:[%s6108_s21 + $0x20] sm:$0xff] %v3435_v60  ;;  %v3384_v36 = vmul.f32 %v6092_v35, %v3348_v63  ;;  %v3263_v60 = vadd.f32 %v3262_v40, %v3214_v49  ;;  %v4438_v49 = vld [vmem:[%s4604_s29 + $0x68] sm:$0xff] }
 0x3e8   : > { %v3404_v6 = vadd.f32 %v6098_v25, %v3384_v36  ;;  %v3350_v29 = vpop.f32.mrf.mxu2 }
 0x3e9   : > { %v3301_v43 = vpop.f32.mrf.mxu1 }
 0x3ea   : > { %v3420_v23 = vadd.f32 %v4430_v27, %v3404_v6  ;;  %v3302_v56 = vadd.f32 %v3301_v43, %v3253_v10  ;;  %v3218_v36 = vpop.f32.mrf.mxu3  ;;  %v4434_v6 = vld [vmem:[%s4604_s29 + $0x48] sm:$0xff] }
 0x3ec   : > { %v3436_v15 = vmax.f32 %v3420_v23, 0.0  ;;  %v3351_v55 = vadd.f32 %v3350_v29, %v3302_v56  ;;  %v3267_v19 = vpop.f32.mrf.mxu0 }
 0x3ee   : > { %3452 = vst [vmem:[%s6108_s21 + $0x28] sm:$0xff] %v3436_v15  ;;  %v3385_v61 = vmul.f32 %v6092_v35, %v3351_v55  ;;  %v4435_v55 = vld [vmem:[%s4604_s29 + $0x50] sm:$0xff] }
 0x3f0   : > { %v3405_v44 = vadd.f32 %v6098_v25, %v3385_v61  ;;  %v3352_v13 = vpop.f32.mrf.mxu2 }
 0x3f1   : > { %v3303_v54 = vpop.f32.mrf.mxu1 }
 0x3f2   : > { %v3421_v24 = vadd.f32 %v4431_v1, %v3405_v44  ;;  %v3304_v53 = vadd.f32 %v3303_v54, %v3255_v12  ;;  %v3220_v12 = vpop.f32.mrf.mxu3 }
 0x3f4   : > { %v3437_v62 = vmax.f32 %v3421_v24, 0.0  ;;  %v3353_v16 = vadd.f32 %v3352_v13, %v3304_v53  ;;  %v3219_v13 = vadd.f32 %v3218_v36, %v6073_v46 }
 0x3f6   : > { %3453 = vst [vmem:[%s6108_s21 + $0x30] sm:$0xff] %v3437_v62  ;;  %v3386_v37 = vmul.f32 %v6092_v35, %v3353_v16  ;;  %v3268_v42 = vadd.f32 %v3267_v19, %v3219_v13  ;;  %v4436_v62 = vld [vmem:[%s4604_s29 + $0x58] sm:$0xff] }
 0x3f8   : > { %v3406_v48 = vadd.f32 %v6098_v25, %v3386_v37  ;;  %v3355_v11 = vpop.f32.mrf.mxu2  ;;  %v3269_v37 = vpop.f32.mrf.mxu0 }
 0x3f9   : > { %v3306_v32 = vpop.f32.mrf.mxu1 }
 0x3fa   : > { %v3422_v41 = vadd.f32 %v4432_v7, %v3406_v48  ;;  %v3307_v26 = vadd.f32 %v3306_v32, %v3258_v4  ;;  %v3221_v48 = vadd.f32 %v3220_v12, %v6079_v3  ;;  %v3223_v4 = vpop.f32.mrf.mxu3 }
 0x3fc   : > { %v3438_v0 = vmax.f32 %v3422_v41, 0.0  ;;  %v3356_v9 = vadd.f32 %v3355_v11, %v3307_v26  ;;  %v3270_v26 = vadd.f32 %v3269_v37, %v3221_v48 }
 0x3fe   : > { %3454 = vst [vmem:[%s6108_s21 + $0x38] sm:$0xff] %v3438_v0  ;;  %v3387_v18 = vmul.f32 %v6092_v35, %v3356_v9  ;;  %v4437_v0 = vld [vmem:[%s4604_s29 + $0x60] sm:$0xff] }
 0x400   : > { %v3407_v51 = vadd.f32 %v6098_v25, %v3387_v18  ;;  %v3357_v5 = vpop.f32.mrf.mxu2  ;;  %v3224_v18 = vadd.f32 %v3223_v4, %v6083_v20 }
 0x401   : > { %v3308_v17 = vpop.f32.mrf.mxu1 }
 0x402   : > { %v3423_v2 = vadd.f32 %v4433_v47, %v3407_v51  ;;  %v3309_v59 = vadd.f32 %v3308_v17, %v3260_v58  ;;  %v3272_v51 = vpop.f32.mrf.mxu0  ;;  %v3225_v58 = vpop.f32.mrf.mxu3 }
 0x403   : > { %v3273_v47 = vadd.f32 %v3272_v51, %v3224_v18  ;;  %v3226_v20 = vadd.f32 %v3225_v58, %v6087_v28 }
 0x404   : > { %v3439_v30 = vmax.f32 %v3423_v2, 0.0  ;;  %v3358_v38 = vadd.f32 %v3357_v5, %v3309_v59 }
 0x406   : > { %3455 = vst [vmem:[%s6108_s21 + $0x40] sm:$0xff] %v3439_v30  ;;  %v3388_v21 = vmul.f32 %v6092_v35, %v3358_v38 }
 0x408   : > { %v3408_v45 = vadd.f32 %v6098_v25, %v3388_v21  ;;  %v3360_v14 = vpop.f32.mrf.mxu2 }
 0x409   : > { %v3311_v63 = vpop.f32.mrf.mxu1 }
 0x40a   : > { %v3424_v29 = vadd.f32 %v4434_v6, %v3408_v45  ;;  %v3312_v10 = vadd.f32 %v3311_v63, %v3263_v60  ;;  %v4439_v6 = vld [vmem:[%s4604_s29 + $0x70] sm:$0xff] }
 0x40c   : > { %v3440_v52 = vmax.f32 %v3424_v29, 0.0  ;;  %v3361_v43 = vadd.f32 %v3360_v14, %v3312_v10  ;;  %v3274_v14 = vpop.f32.mrf.mxu0 }
 0x40d   : > { %v3275_v63 = vadd.f32 %v3274_v14, %v3226_v20 }
 0x40e   : > { %3456 = vst [vmem:[%s6108_s21 + $0x48] sm:$0xff] %v3440_v52  ;;  %v3389_v27 = vmul.f32 %v6092_v35, %v3361_v43 }
 0x410   : > { %v3409_v23 = vadd.f32 %v6098_v25, %v3389_v27  ;;  %v3362_v56 = vpop.f32.mrf.mxu2 }
 0x411   : > { %v3313_v15 = vpop.f32.mrf.mxu1 }
 0x412   : > { %v3425_v61 = vadd.f32 %v4435_v55, %v3409_v23  ;;  %v3314_v44 = vadd.f32 %v3313_v15, %v3265_v22  ;;  %v4440_v23 = vld [vmem:[%s4604_s29 + $0x78] sm:$0xff] }
 0x414   : > { %v3441_v8 = vmax.f32 %v3425_v61, 0.0  ;;  %v3363_v54 = vadd.f32 %v3362_v56, %v3314_v44 }
 0x416   : > { %3457 = vst [vmem:[%s6108_s21 + $0x50] sm:$0xff] %v3441_v8  ;;  %v3390_v1 = vmul.f32 %v6092_v35, %v3363_v54 }
 0x418   : > { %v3410_v24 = vadd.f32 %v6098_v25, %v3390_v1  ;;  %v3365_v53 = vpop.f32.mrf.mxu2 }
 0x419   : > { %v3316_v50 = vpop.f32.mrf.mxu1 }
 0x41a   : > { %v3426_v16 = vadd.f32 %v4436_v62, %v3410_v24  ;;  %v3317_v57 = vadd.f32 %v3316_v50, %v3268_v42 }
 0x41c   : > { %v3442_v46 = vmax.f32 %v3426_v16, 0.0  ;;  %v3366_v11 = vadd.f32 %v3365_v53, %v3317_v57 }
 0x41e   : > { %3458 = vst [vmem:[%s6108_s21 + $0x58] sm:$0xff] %v3442_v46  ;;  %v3391_v32 = vmul.f32 %v6092_v35, %v3366_v11 }
 0x420   : > { %v3411_v7 = vadd.f32 %v6098_v25, %v3391_v32  ;;  %v3367_v41 = vpop.f32.mrf.mxu2 }
 0x421   : > { %v3318_v31 = vpop.f32.mrf.mxu1 }
 0x422   : > { %v3427_v9 = vadd.f32 %v4437_v0, %v3411_v7  ;;  %v3319_v40 = vadd.f32 %v3318_v31, %v3270_v26 }
 0x424   : > { %v3443_v34 = vmax.f32 %v3427_v9, 0.0  ;;  %v3368_v3 = vadd.f32 %v3367_v41, %v3319_v40 }
 0x426   : > { %3459 = vst [vmem:[%s6108_s21 + $0x60] sm:$0xff] %v3443_v34  ;;  %v3392_v5 = vmul.f32 %v6092_v35, %v3368_v3 }
 0x428   : > { %v3412_v17 = vadd.f32 %v6098_v25, %v3392_v5  ;;  %v3370_v2 = vpop.f32.mrf.mxu2 }
 0x429   : > { %v3321_v59 = vpop.f32.mrf.mxu1 }
 0x42a   : > { %v3428_v30 = vadd.f32 %v4438_v49, %v3412_v17  ;;  %v3322_v38 = vadd.f32 %v3321_v59, %v3273_v47 }
 0x42c   : > { %v3444_v21 = vmax.f32 %v3428_v30, 0.0  ;;  %v3371_v39 = vadd.f32 %v3370_v2, %v3322_v38 }
 0x42e   : > { %3460 = vst [vmem:[%s6108_s21 + $0x68] sm:$0xff] %v3444_v21  ;;  %v3393_v45 = vmul.f32 %v6092_v35, %v3371_v39 }
 0x430   : > { %v3413_v60 = vadd.f32 %v6098_v25, %v3393_v45  ;;  %v3372_v33 = vpop.f32.mrf.mxu2 }
 0x431   : > { %v3323_v36 = vpop.f32.mrf.mxu1 }
 0x432   : > { %v3429_v29 = vadd.f32 %v4439_v6, %v3413_v60  ;;  %v3324_v10 = vadd.f32 %v3323_v36, %v3275_v63 }
 0x434   : > { %v3445_v52 = vmax.f32 %v3429_v29, 0.0  ;;  %v3373_v43 = vadd.f32 %v3372_v33, %v3324_v10 }
 0x436   : > { %3461 = vst [vmem:[%s6108_s21 + $0x70] sm:$0xff] %v3445_v52  ;;  %v3394_v28 = vmul.f32 %v6092_v35, %v3373_v43 }
 0x438   : > { %v3414_v27 = vadd.f32 %v6098_v25, %v3394_v28 }
 0x43a   : > { %v3430_v56 = vadd.f32 %v4440_v23, %v3414_v27 }
 0x43c   : > { %v3446_v22 = vmax.f32 %v3430_v56, 0.0 }
 0x43e   : > { %3462 = vst [vmem:[%s6108_s21 + $0x78] sm:$0xff] %v3446_v22 }
 0x43f PF: > { %s19_s13 = sadd.s32 1, %s4479_s13   ;;  %s6266_s30 = smov %s4471_s11 }
 0x440   : > { %p16_p11 = scmp.ge.s32.totalorder %s19_s13, 6   ;;  %s6267_s10 = smov %s4475_s12 }
 0x441   : > { %s6268_s11 = smov %s6271_s14  ;;  %s6269_s12 = smov %s6275_s15 }
 0x442   :  { %18 = sbr.rel (!%p16_p11) target bundleno = 3 (0x3), region = 92 }

</bundles_post_ra>
